<compile_context>
chip_gen: v7x
topology: tpu7x:2x2x1
jax: 0.10.0
libtpu: 0.0.40
codegen_flags: <defaults>
</compile_context>

<pallas_src>
import numpy as np
import jax
import jax.numpy as jnp
from jax.experimental import pallas as pl
from jax.experimental.pallas import tpu as pltpu


# ----------------------------------------------------------------------------
# Pallas kernel: one grid step processes TILE_B datasets.
#   wp_ref: (1, 1, D)      combined weighted parameters (broadcast input)
#   w_ref : (TILE_B, 1)    mixing weights of the datasets in this tile
#   x_ref : (TILE_B, n, D) features
#   y_ref : (TILE_B, n)    targets (lane-dense)
#   o_ref : (1, 8, 128)    partial loss for this tile (scalar broadcast into a
#                          dense (8,128) block so the out BlockSpec satisfies
#                          the (8,128) tiling rule and stores are unmasked)
# ----------------------------------------------------------------------------
def _gd_loss_kernel(wp_ref, w_ref, x_ref, y_ref, o_ref):
    x = x_ref[...]                                   # (TILE_B, n, D)
    wp = wp_ref[...]                                 # (1, 1, D) -> broadcasts
    pred = jnp.sum(x * wp, axis=-1)                  # (TILE_B, n)  lane reduce
    resid = pred - y_ref[...]                        # (TILE_B, n)
    sse = jnp.sum(resid * resid, axis=-1, keepdims=True)   # (TILE_B, 1)
    partial = jnp.sum(w_ref[...] * sse)              # scalar: sum_b w_b * sse_b
    o_ref[...] = jnp.broadcast_to(partial, o_ref.shape).astype(jnp.float32)


def _choose_tile_b(N, n, D, target_bytes=4 << 20):
    """Largest multiple-of-8 divisor of N whose feature block is <= target."""
    per_dataset = n * D * 4
    want = max(1, target_bytes // max(per_dataset, 1))
    if want >= N:
        return N
    best = None
    t = 8
    while t <= min(want, N):
        if N % t == 0:
            best = t
        t += 8
    return best if best is not None else N


def gd_param_opt_loss(weights, params, features, targets, *, tile_b=None):
    """
    weights:  (N,)      float32 — mixing weights from the init algorithm
    params:   (N, D)    float32 — per-dataset ridge-regression parameters
    features: (N, n, D) float32 — featuremap(X_i), stacked
    targets:  (N, n)    float32 — Y_i, stacked
    returns scalar loss (float32)
    """
    weights = jnp.asarray(weights, jnp.float32)
    params = jnp.asarray(params, jnp.float32)
    features = jnp.asarray(features, jnp.float32)
    targets = jnp.asarray(targets, jnp.float32)
    N, n, D = features.shape

    # weighted_params = sum_i w_i * p_i — trivially cheap, done outside the
    # kernel so the kernel holds no (D, N) params buffer resident in VMEM.
    wp = (weights @ params).reshape(1, 1, D)

    if tile_b is None:
        tile_b = _choose_tile_b(N, n, D)
    # TILE_B must divide N and be a multiple of 8 (or equal N) so the
    # (TILE_B, n) / (TILE_B, 1) blocks satisfy the sublane tiling rule.
    if N % tile_b != 0 or not (tile_b % 8 == 0 or tile_b == N):
        tile_b = N
    num_tiles = N // tile_b

    w_col = weights.reshape(N, 1)

    partials = pl.pallas_call(
        _gd_loss_kernel,
        out_shape=jax.ShapeDtypeStruct((num_tiles, 8, 128), jnp.float32),
        grid_spec=pltpu.PrefetchScalarGridSpec(
            num_scalar_prefetch=0,
            grid=(num_tiles,),
            in_specs=[
                pl.BlockSpec((1, 1, D), lambda i: (0, 0, 0)),        # wp
                pl.BlockSpec((tile_b, 1), lambda i: (i, 0)),         # weights
                pl.BlockSpec((tile_b, n, D), lambda i: (i, 0, 0)),   # features
                pl.BlockSpec((tile_b, n), lambda i: (i, 0)),         # targets
            ],
            out_specs=pl.BlockSpec((1, 8, 128), lambda i: (i, 0, 0)),
        ),
        compiler_params=pltpu.CompilerParams(
            dimension_semantics=("parallel",),        # independent partials
            vmem_limit_bytes=48 * 1024 * 1024,
        ),
    )(wp, w_col, features, targets)

    # Sum the per-tile partial losses (one meaningful scalar per tile).
    return jnp.sum(partials[:, 0, 0])


# ----------------------------------------------------------------------------
# Deterministic __init__-equivalent glue (plain JAX): identity featuremap,
# standard_init (Algorithm 2) — ridge regression per dataset + MSE-based
# weight formula.  Mirrors GDParamOptModule.__init__ with 'standard_init'.
# TODO(synk): wasserstein_init needs the POT package (ot.emd2) — not ported.
# ----------------------------------------------------------------------------
def ridge_reg(X, Y, ridge_coeff):
    D = X.shape[1]
    A = X.T @ X + ridge_coeff * jnp.eye(D, dtype=X.dtype)
    b = X.T @ Y
    return jnp.linalg.solve(A, b)             # (D,)


def standard_init(datasets, ridge_coeff, info_sharing_level):
    eta = info_sharing_level
    X0, Y0 = datasets[0]
    params, scores = [], []
    for X, Y in datasets:
        p = ridge_reg(X, Y, ridge_coeff)
        params.append(p)
        scores.append(jnp.mean((X0 @ p - Y0) ** 2))
    scores = jnp.stack(scores)
    s0 = scores[0]
    w = jnp.maximum(0.0, s0 + eta - scores)
    factors = jnp.exp(scores / eta)
    w_star = jnp.nan_to_num(factors * w, nan=0.0, posinf=0.0, neginf=0.0)
    weights = w_star / jnp.sum(w_star)
    return weights, jnp.stack(params)


def forward_reference(weights, params, features, targets):
    wp = jnp.sum(weights[:, None] * params, axis=0)            # (D,)
    loss = 0.0
    for i in range(features.shape[0]):
        loss = loss + weights[i] * jnp.sum((features[i] @ wp - targets[i]) ** 2)
    return loss


if __name__ == "__main__":
    N, n, D = 16, 64, 32        # 16 datasets, 64 samples each, 32 features
    key = jax.random.PRNGKey(0)
    kx, kw, ky = jax.random.split(key, 3)

    # Synthetic datasets; featuremap = identity, so features == X.
    X_all = jax.random.normal(kx, (N, n, D), dtype=jnp.float32)
    true_w = jax.random.normal(kw, (D,), dtype=jnp.float32)
    noise = 0.1 * jax.random.normal(ky, (N, n), dtype=jnp.float32)
    Y_all = jnp.einsum("bnd,d->bn", X_all, true_w) + noise

    datasets = [(X_all[i], Y_all[i]) for i in range(N)]
    weights, params = standard_init(datasets, ridge_coeff=0.1,
                                    info_sharing_level=0.5)
    weights = weights.astype(jnp.float32)
    params = params.astype(jnp.float32)

    # tile_b=8 -> grid of 2 steps, exercising the batched/parallel path.
    loss = gd_param_opt_loss(weights, params, X_all, Y_all, tile_b=8)
    loss = jax.block_until_ready(loss)

    ref = forward_reference(weights, params, X_all, Y_all)
    assert np.allclose(np.asarray(loss), np.asarray(ref), rtol=1e-3, atol=1e-4), (
        f"mismatch: pallas={loss}, ref={ref}")

    print("KERNEL_OK")
</pallas_src>

<mosaic_0001>
module attributes {stable_mosaic.version = 11 : i64} {
  func.func @_gd_loss_kernel(%arg0: i32, %arg1: memref<1x1x32xf32, #tpu.memory_space<vmem>>, %arg2: memref<8x1xf32, #tpu.memory_space<vmem>>, %arg3: memref<8x64x32xf32, #tpu.memory_space<vmem>>, %arg4: memref<8x64xf32, #tpu.memory_space<vmem>>, %arg5: memref<1x8x128xf32, #tpu.memory_space<vmem>>) attributes {dimension_semantics = [#tpu.dimension_semantics<parallel>], iteration_bounds = array<i64: 2>, scalar_prefetch = 0 : i64, scratch_operands = 0 : i64, tpu.core_type = #tpu.core_type<tc>, window_params = [{pipeline_mode = #tpu.pipeline_mode<synchronous>, transform_indices = @transform_0, window_bounds = array<i64: 1, 1, 32>}, {transform_indices = @transform_1, window_bounds = array<i64: 8, 1>}, {transform_indices = @transform_2, window_bounds = array<i64: 8, 64, 32>}, {transform_indices = @transform_3, window_bounds = array<i64: 8, 64>}, {transform_indices = @transform_4, window_bounds = array<i64: 1, 8, 128>}]} {
    %c0 = arith.constant 0 : index
    %c0_0 = arith.constant 0 : index
    %c0_1 = arith.constant 0 : index
    %0 = vector.load %arg3[%c0, %c0_0, %c0_1] : memref<8x64x32xf32, #tpu.memory_space<vmem>>, vector<8x64x32xf32>
    %c0_2 = arith.constant 0 : index
    %c0_3 = arith.constant 0 : index
    %c0_4 = arith.constant 0 : index
    %1 = vector.load %arg1[%c0_2, %c0_3, %c0_4] : memref<1x1x32xf32, #tpu.memory_space<vmem>>, vector<1x1x32xf32>
    %2 = vector.broadcast %1 : vector<1x1x32xf32> to vector<8x64x32xf32>
    %3 = arith.mulf %0, %2 : vector<8x64x32xf32>
    %cst = arith.constant dense<0.000000e+00> : vector<8x64xf32>
    %4 = vector.multi_reduction <add>, %3, %cst [2] : vector<8x64x32xf32> to vector<8x64xf32>
    %c0_5 = arith.constant 0 : index
    %c0_6 = arith.constant 0 : index
    %5 = vector.load %arg4[%c0_5, %c0_6] : memref<8x64xf32, #tpu.memory_space<vmem>>, vector<8x64xf32>
    %6 = arith.subf %4, %5 : vector<8x64xf32>
    %7 = arith.mulf %6, %6 : vector<8x64xf32>
    %cst_7 = arith.constant dense<0.000000e+00> : vector<8xf32>
    %8 = vector.multi_reduction <add>, %7, %cst_7 [1] : vector<8x64xf32> to vector<8xf32>
    %9 = vector.shape_cast %8 : vector<8xf32> to vector<8x1xf32>
    %c0_8 = arith.constant 0 : index
    %c0_9 = arith.constant 0 : index
    %10 = vector.load %arg2[%c0_8, %c0_9] : memref<8x1xf32, #tpu.memory_space<vmem>>, vector<8x1xf32>
    %11 = arith.mulf %10, %9 : vector<8x1xf32>
    %12 = vector.shape_cast %11 : vector<8x1xf32> to vector<1x8x1xf32>
    %cst_10 = arith.constant dense<0.000000e+00> : vector<1xf32>
    %13 = vector.multi_reduction <add>, %12, %cst_10 [1, 2] : vector<1x8x1xf32> to vector<1xf32>
    %14 = vector.shape_cast %13 : vector<1xf32> to vector<1x1x1xf32>
    %15 = vector.extract %14[0, 0, 0] : f32 from vector<1x1x1xf32>
    %16 = vector.broadcast %15 : f32 to vector<1x8x128xf32>
    %c0_11 = arith.constant 0 : index
    %c0_12 = arith.constant 0 : index
    %c0_13 = arith.constant 0 : index
    %17 = vector.load %arg5[%c0_11, %c0_12, %c0_13] : memref<1x8x128xf32, #tpu.memory_space<vmem>>, vector<1x8x128xf32>
    tpu.vector_store %arg5[%c0_11, %c0_12, %c0_13], %16 {strides = array<i32>} : memref<1x8x128xf32, #tpu.memory_space<vmem>>, vector<1x8x128xf32>,
    return
  }
  func.func @transform_0(%arg0: i32) -> (i32, i32, i32) {
    %c0_i32 = arith.constant 0 : i32
    %c0_i32_0 = arith.constant 0 : i32
    %c0_i32_1 = arith.constant 0 : i32
    %c0_i32_2 = arith.constant 0 : i32
    return %c0_i32, %c0_i32_0, %c0_i32_1 : i32, i32, i32
  }
  func.func @transform_1(%arg0: i32) -> (i32, i32) {
    %c0_i32 = arith.constant 0 : i32
    %c0_i32_0 = arith.constant 0 : i32
    return %arg0, %c0_i32 : i32, i32
  }
  func.func @transform_2(%arg0: i32) -> (i32, i32, i32) {
    %c0_i32 = arith.constant 0 : i32
    %c0_i32_0 = arith.constant 0 : i32
    %c0_i32_1 = arith.constant 0 : i32
    return %arg0, %c0_i32, %c0_i32_0 : i32, i32, i32
  }
  func.func @transform_3(%arg0: i32) -> (i32, i32) {
    %c0_i32 = arith.constant 0 : i32
    %c0_i32_0 = arith.constant 0 : i32
    return %arg0, %c0_i32 : i32, i32
  }
  func.func @transform_4(%arg0: i32) -> (i32, i32, i32) {
    %c0_i32 = arith.constant 0 : i32
    %c0_i32_0 = arith.constant 0 : i32
    %c0_i32_1 = arith.constant 0 : i32
    return %arg0, %c0_i32, %c0_i32_0 : i32, i32, i32
  }
}

</mosaic_0001>

<bundles_post_ra>
// kernel: tpu_custom_call.1
= control target key start
LH: loop header
LB: loop body
LE: loop exit
PB: predicated region body
PF: predicated region fallthrough
CT: control target
= control target key end

     0   :  { %9 = vsyncpa [#allocation3], 0  ;;  %s2753_s0 = inlined_call_operand.vmem [shape: f32[1,1,32], index: 0, kind: input, shape index: {}]   ;;  %s2754_s1 = inlined_call_operand.vmem [shape: f32[16,1], index: 1, kind: input, shape index: {}]   ;;  %s2755_s2 = inlined_call_operand.vmem [shape: f32[16,64,32], index: 2, kind: input, shape index: {}]   ;;  %s2756_s3 = inlined_call_operand.vmem [shape: f32[16,64], index: 3, kind: input, shape index: {}]   ;;  %s2757_s4 = inlined_call_operand.hbm [shape: f32[2,8,128], index: 4, kind: output, shape index: {}]  }
   0x1   :  { %11 = vsyncpa [#allocation3 + $0x1], 0  ;;  %s1903_s15 = smov 0   ;;  %s1905_s16 = smov 0  }
   0x2   :  { %s1907_s17 = smov 0   ;;  %s1909_s18 = smov 0  }
   0x3 LB: > { %s1924_s19 = sadd.s32 4294967295, %s1874_s18   ;;  %s1752_s20 = sadd.s32 4294967294, %s1874_s18   ;;  %s1874_s18 = sphi %s1909_s18, %s2803_s18   ;;  %s1870_s17 = sphi %s1907_s17, %s2802_s17   ;;  %s1866_s16 = sphi %s1905_s16, %s2801_s16   ;;  %s1862_s15 = sphi %s1903_s15, %s2800_s15  }
   0x4   : > { %s1928_s21 = sadd.s32 1, %s1874_s18   ;;  %s123_s22 = sadd.s32 1, %s1870_s17 }
   0x5   : > { %s120_s23 = ssub.s32 %s1874_s18, %s1928_s21  ;;  %p133_p0 = scmp.ne.s32.totalorder %s1870_s17, %s1866_s16 }
   0x6   : > { %p121_p1 = scmp.eq.s32.totalorder %s120_s23, 0  ;;  %p134_p2 = scmp.eq.s32.totalorder %s1924_s19, 1 }
   0x7   : > { %p139_p3 = scmp.ne.s32.totalorder %s1866_s16, %s1862_s15  ;;  %p140_p4 = scmp.eq.s32.totalorder %s1752_s20, 1 }
   0x8   : > { %s1939_s24 = scalar_select %p121_p1, %s1870_s17, %s123_s22  }
   0x9   : > { %p1941_p5 = por %p134_p2, %p133_p0  ;;  %p1945_p6 = por %p140_p4, %p139_p3 }
   0xa   : > { %p1755_p7 = scmp.ge.s32.totalorder %s1874_s18, 1  ;;  %p185_p8 = scmp.lt.s32.totalorder %s1874_s18, 3 }
   0xc   : > { %p186_p9 = pnand %p1755_p7, %p185_p8 }
   0xe   : > { %189 = sbr.rel (%p186_p9) target bundleno = 955 (0x3bb), region = 36 }
  0x15   : > { %s1758_s27 = sshll.u32 %s1924_s19, 3  ;;  %v1955_v0 = vld [vmem:[%s2753_s0] ss:$0 sm:$0xff]  ;;  %vm370_vm0 = vcmask 261120   ;;  %p220_p11 = scmp.lt.s32.totalorder %s1924_s19, 1  ;;  %vm1304_vm1 = vcmask 130112  }
  0x16   : > { %p225_p10 = scmp.lt.s32.totalorder %s1758_s27, 15  ;;  %vm1311_vm2 = vcmask 195712   ;;  %vm1318_vm3 = vcmask 261312   ;;  %vm1325_vm4 = vcmask 326912   ;;  %vm1332_vm5 = vcmask 392512   ;;  %s217_s22 = sand.u32 1, %s1866_s16  }
  0x17   : > { %s2273_s8 = scalar_select %p220_p11, %s1924_s19, 1  ;;  %vm1339_vm6 = vcmask 458112   ;;  %vm1346_vm7 = vcmask 523712   ;;  %vm1621_vm8 = vcmask 1041409   ;;  %vm1623_vm9 = vcmask 1042434  }
  0x18   : > { %s2805_s27 = smov (!%p225_p10, %s1758_s27), 15  ;;  %vm1625_vm10 = vcmask 1043459   ;;  %vm1627_vm11 = vcmask 1044484   ;;  %vm1629_vm12 = vcmask 1045509   ;;  %vm1631_vm13 = vcmask 1046534   ;;  %s1756_s23 = sshll.u32 %s217_s22, 3 }
  0x19   : > { %s1767_s28 = sshll.u32 %s2805_s27, 6  ;;  %s1757_s9 = sshll.u32 %s2273_s8, 3  ;;  %vm1633_vm14 = vcmask 1047559   ;;  %vm1636_vm15 = vcmask 523264  }
  0x1a   : > { %s1960_s7 = scalar_lea.vmem %s2755_s2, %s1767_s28  ;;  %s234_s12 = scalar_lea.vmem %s2756_s3, %s1757_s9 }
  0x1b   : > { %v237_v1 = vld [vmem:[%s1960_s7 + $0x10] sm:$0xff]  ;;  %v235_v2 = vld [vmem:[%s1960_s7] sm:$0xff]  ;;  %v238_v3 = vld [vmem:[%s1960_s7 + $0x18] sm:$0xff]  ;;  %s223_s20 = scalar_lea.vmem %s2754_s1, %s1757_s9  ;;  %s219_s27 = scalar_lea.vmem [#allocation2], %s1756_s23 }
  0x1c   : > { %v308_v4 = vmul.f32 %v1955_v0, %v237_v1  ;;  %v306_v5 = vmul.f32 %v1955_v0, %v235_v2  ;;  %v309_v6 = vmul.f32 %v1955_v0, %v238_v3  ;;  %v236_v7 = vld [vmem:[%s1960_s7 + $0x8] sm:$0xff]  ;;  %v239_v10 = vld [vmem:[%s1960_s7 + $0x20] sm:$0xff]  ;;  %v242_v17 = vld [vmem:[%s1960_s7 + $0x38] sm:$0xff]  ;;  %s1669_s28 = sshll.u32 %s219_s27, 4  ;;  %s1764_s29 = sshll.u32 %s1924_s19, 7  ;;  %s2708_s28 = int_to_ptr.vmem [resolvable:$true] %s1669_s28 }
  0x1d   : > { %v307_v8 = vmul.f32 %v1955_v0, %v236_v7  ;;  %v240_v9 = vld [vmem:[%s1960_s7 + $0x28] sm:$0xff]  ;;  %v310_v16 = vmul.f32 %v1955_v0, %v239_v10  ;;  %v241_v18 = vld [vmem:[%s1960_s7 + $0x30] sm:$0xff]  ;;  %v243_v20 = vld [vmem:[%s1960_s7 + $0x40] sm:$0xff]  ;;  %v313_v26 = vmul.f32 %v1955_v0, %v242_v17  ;;  %s1656_s8 = scalar_lea.sflag [#allocation3], %s217_s22  ;;  %s1812_s9 = scalar_lea.vmem %s2708_s28, 128 }
  0x1e   : > { %v377_v11 = vsel %vm370_vm0, %v308_v4, 0.0  ;;  %v371_v12 = vsel %vm370_vm0, %v306_v5, 0.0  ;;  %v380_v13 = vsel %vm370_vm0, %v309_v6, 0.0  ;;  %v311_v15 = vmul.f32 %v1955_v0, %v240_v9  ;;  %v244_v19 = vld [vmem:[%s1960_s7 + $0x48] sm:$0xff]  ;;  %v246_v21 = vld [vmem:[%s1960_s7 + $0x58] sm:$0xff]  ;;  %v245_v22 = vld [vmem:[%s1960_s7 + $0x50] sm:$0xff]  ;;  %p1813_p12 = scmp.ne.s32.totalorder %s2708_s28, %s1812_s9 }
  0x1f   : > { %378 = vadd.xlane.f32.xlu1 %v377_v11  ;;  %372 = vadd.xlane.f32.xlu0 %v371_v12  ;;  %v374_v14 = vsel %vm370_vm0, %v307_v8, 0.0  ;;  %v248_v23 = vld [vmem:[%s1960_s7 + $0x68] sm:$0xff]  ;;  %v383_v25 = vsel %vm370_vm0, %v310_v16, 0.0  ;;  %v312_v27 = vmul.f32 %v1955_v0, %v241_v18  ;;  %v247_v28 = vld [vmem:[%s1960_s7 + $0x60] sm:$0xff]  ;;  %v250_v29 = vld [vmem:[%s1960_s7 + $0x78] sm:$0xff]  ;;  %v315_v30 = vmul.f32 %v1955_v0, %v244_v19  ;;  %s1877_s19 = smov [#allocation2]  }
  0x20   : > { %v386_v24 = vsel %vm370_vm0, %v311_v15, 0.0  ;;  %v314_v31 = vmul.f32 %v1955_v0, %v243_v20  ;;  %v317_v32 = vmul.f32 %v1955_v0, %v246_v21  ;;  %v316_v33 = vmul.f32 %v1955_v0, %v245_v22  ;;  %v249_v35 = vld [vmem:[%s1960_s7 + $0x70] sm:$0xff]  ;;  %v252_v40 = vld [vmem:[%s1960_s7 + $0x88] sm:$0xff]  ;;  %v251_v41 = vld [vmem:[%s1960_s7 + $0x80] sm:$0xff]  ;;  %p1814_p13 = pnand %p1813_p12, %p1941_p5  ;;  %s1816_s10 = sshll.u32 %s1877_s19, 4  ;;  %s1817_s10 = int_to_ptr.vmem [resolvable:$false] %s1816_s10 }
  0x21   : > { %v319_v34 = vmul.f32 %v1955_v0, %v248_v23  ;;  %v318_v36 = vmul.f32 %v1955_v0, %v247_v28  ;;  %v321_v37 = vmul.f32 %v1955_v0, %v250_v29  ;;  %v392_v38 = vsel %vm370_vm0, %v313_v26, 0.0  ;;  %v254_v42 = vld [vmem:[%s1960_s7 + $0x98] sm:$0xff]  ;;  %v268_v46 = vld [vmem:[%s1960_s7 + $0x108] sm:$0xff]  ;;  %v267_v47 = vld [vmem:[%s1960_s7 + $0x100] sm:$0xff]  ;;  %s1818_s11 = scalar_lea.vmem %s1817_s10, 256  ;;  %p1819_p1 = scmp.lt.s32.totalorder %s2708_s28, %s1817_s10 }
  0x22   : > { %v389_v39 = vsel %vm370_vm0, %v312_v27, 0.0  ;;  %v398_v43 = vsel %vm370_vm0, %v315_v30, 0.0  ;;  %v395_v44 = vsel %vm370_vm0, %v314_v31, 0.0  ;;  %v320_v45 = vmul.f32 %v1955_v0, %v249_v35  ;;  %v270_v48 = vld [vmem:[%s1960_s7 + $0x118] sm:$0xff]  ;;  %v269_v52 = vld [vmem:[%s1960_s7 + $0x110] sm:$0xff]  ;;  %v272_v53 = vld [vmem:[%s1960_s7 + $0x128] sm:$0xff]  ;;  %p1815_p0 = pneg %p1814_p13  ;;  %p1820_p2 = scmp.lt.s32.totalorder %s1818_s11, %s1812_s9 }
  0x23   : > { %381 = vadd.xlane.f32.xlu1 %v380_v13  ;;  %375 = vadd.xlane.f32.xlu0 %v374_v14  ;;  %v404_v49 = vsel %vm370_vm0, %v317_v32, 0.0  ;;  %v401_v50 = vsel %vm370_vm0, %v316_v33, 0.0  ;;  %v2013_v51 = vsel %vm370_vm0, %v319_v34, 0.0  ;;  %v271_v54 = vld [vmem:[%s1960_s7 + $0x120] sm:$0xff]  ;;  %v2019_v55 = vsel %vm370_vm0, %v318_v36, 0.0  ;;  %v274_v59 = vld [vmem:[%s1960_s7 + $0x138] sm:$0xff] }
  0x24   : > { %v2022_v56 = vsel %vm370_vm0, %v321_v37, 0.0  ;;  %v2025_v57 = vmul.f32 %v1955_v0, %v252_v40  ;;  %v2028_v58 = vmul.f32 %v1955_v0, %v251_v41  ;;  %v2032_v60 = vmul.f32 %v1955_v0, %v254_v42  ;;  %v273_v1 = vld [vmem:[%s1960_s7 + $0x130] sm:$0xff]  ;;  %v276_v6 = vld [vmem:[%s1960_s7 + $0x148] sm:$0xff]  ;;  %v275_v7 = vld [vmem:[%s1960_s7 + $0x140] sm:$0xff]  ;;  %p1821_p3 = por %p1820_p2, %p1819_p1 }
  0x25   : > { %v339_v61 = vmul.f32 %v1955_v0, %v268_v46  ;;  %v338_v62 = vmul.f32 %v1955_v0, %v267_v47  ;;  %v341_v63 = vmul.f32 %v1955_v0, %v270_v48  ;;  %v2039_v2 = vsel %vm370_vm0, %v320_v45, 0.0  ;;  %v278_v8 = vld [vmem:[%s1960_s7 + $0x158] sm:$0xff]  ;;  %v277_v13 = vld [vmem:[%s1960_s7 + $0x150] sm:$0xff]  ;;  %v280_v14 = vld [vmem:[%s1960_s7 + $0x168] sm:$0xff] }
  0x26   : > { %v340_v3 = vmul.f32 %v1955_v0, %v269_v52  ;;  %v343_v4 = vmul.f32 %v1955_v0, %v272_v53  ;;  %v342_v5 = vmul.f32 %v1955_v0, %v271_v54  ;;  %v345_v12 = vmul.f32 %v1955_v0, %v274_v59  ;;  %v279_v15 = vld [vmem:[%s1960_s7 + $0x160] sm:$0xff]  ;;  %v282_v20 = vld [vmem:[%s1960_s7 + $0x178] sm:$0xff]  ;;  %v284_v30 = vld [vmem:[%s1960_s7 + $0x188] sm:$0xff]  ;;  %p1822_p4 = pnand %p1821_p3, %p1815_p0 }
  0x27   : > { %387 = vadd.xlane.f32.xlu1 %v386_v24  ;;  %384 = vadd.xlane.f32.xlu0 %v383_v25  ;;  %v2048_v9 = vsel %vm370_vm0, %v339_v61, 0.0  ;;  %v2051_v10 = vsel %vm370_vm0, %v338_v62, 0.0  ;;  %v2054_v11 = vsel %vm370_vm0, %v341_v63, 0.0  ;;  %v344_v19 = vmul.f32 %v1955_v0, %v273_v1  ;;  %v281_v25 = vld [vmem:[%s1960_s7 + $0x170] sm:$0xff]  ;;  %v283_v31 = vld [vmem:[%s1960_s7 + $0x180] sm:$0xff]  ;;  %v286_v32 = vld [vmem:[%s1960_s7 + $0x198] sm:$0xff] }
  0x28   : > { %v2061_v16 = vsel %vm370_vm0, %v340_v3, 0.0  ;;  %v2064_v17 = vsel %vm370_vm0, %v343_v4, 0.0  ;;  %v2067_v18 = vsel %vm370_vm0, %v342_v5, 0.0  ;;  %v2072_v21 = vsel %vm370_vm0, %v345_v12, 0.0  ;;  %v285_v37 = vld [vmem:[%s1960_s7 + $0x190] sm:$0xff]  ;;  %v292_v59 = vld [vmem:[%s1960_s7 + $0x1c8] sm:$0xff] }
  0x29   : > { %v347_v22 = vmul.f32 %v1955_v0, %v276_v6  ;;  %v346_v23 = vmul.f32 %v1955_v0, %v275_v7  ;;  %v349_v24 = vmul.f32 %v1955_v0, %v278_v8  ;;  %v2079_v26 = vsel %vm370_vm0, %v344_v19, 0.0  ;;  %v291_v61 = vld [vmem:[%s1960_s7 + $0x1c0] sm:$0xff]  ;;  %v294_v62 = vld [vmem:[%s1960_s7 + $0x1d8] sm:$0xff]  ;;  %v293_v5 = vld [vmem:[%s1960_s7 + $0x1d0] sm:$0xff] }
  0x2a   : > { %v348_v27 = vmul.f32 %v1955_v0, %v277_v13  ;;  %v351_v28 = vmul.f32 %v1955_v0, %v280_v14  ;;  %v350_v29 = vmul.f32 %v1955_v0, %v279_v15  ;;  %v353_v36 = vmul.f32 %v1955_v0, %v282_v20  ;;  %v296_v6 = vld [vmem:[%s1960_s7 + $0x1e8] sm:$0xff]  ;;  %v295_v7 = vld [vmem:[%s1960_s7 + $0x1e0] sm:$0xff]  ;;  %v298_v15 = vld [vmem:[%s1960_s7 + $0x1f8] sm:$0xff] }
  0x2b   : > { %393 = vadd.xlane.f32.xlu1 %v392_v38  ;;  %390 = vadd.xlane.f32.xlu0 %v389_v39  ;;  %v2088_v33 = vsel %vm370_vm0, %v347_v22, 0.0  ;;  %v2091_v34 = vsel %vm370_vm0, %v346_v23, 0.0  ;;  %v2094_v35 = vsel %vm370_vm0, %v349_v24, 0.0  ;;  %v288_v38 = vld [vmem:[%s1960_s7 + $0x1a8] sm:$0xff]  ;;  %v287_v39 = vld [vmem:[%s1960_s7 + $0x1a0] sm:$0xff]  ;;  %v355_v46 = vmul.f32 %v1955_v0, %v284_v30  ;;  %v297_v22 = vld [vmem:[%s1960_s7 + $0x1f0] sm:$0xff] }
  0x2c   : > { %v2101_v40 = vsel %vm370_vm0, %v348_v27, 0.0  ;;  %v2104_v41 = vsel %vm370_vm0, %v351_v28, 0.0  ;;  %v2107_v42 = vsel %vm370_vm0, %v350_v29, 0.0  ;;  %v2112_v45 = vsel %vm370_vm0, %v353_v36, 0.0  ;;  %v253_v23 = vld [vmem:[%s1960_s7 + $0x90] sm:$0xff] }
  0x2d   : > { %v354_v47 = vmul.f32 %v1955_v0, %v283_v31  ;;  %v357_v48 = vmul.f32 %v1955_v0, %v286_v32  ;;  %v356_v52 = vmul.f32 %v1955_v0, %v285_v37  ;;  %v359_v53 = vmul.f32 %v1955_v0, %v288_v38 }
  0x2e   : > { %v358_v54 = vmul.f32 %v1955_v0, %v287_v39  ;;  %v2128_v63 = vsel %vm370_vm0, %v355_v46, 0.0  ;;  %v363_v20 = vmul.f32 %v1955_v0, %v292_v59  ;;  %v367_v27 = vmul.f32 %v1955_v0, %v296_v6  ;;  %v256_v46 = vld [vmem:[%s1960_s7 + $0xa8] sm:$0xff] }
  0x2f   : > { %399 = vadd.xlane.f32.xlu1 %v398_v43  ;;  %396 = vadd.xlane.f32.xlu0 %v395_v44  ;;  %v352_v43 = vmul.f32 %v1955_v0, %v281_v25  ;;  %v290_v44 = vld [vmem:[%s1960_s7 + $0x1b8] sm:$0xff]  ;;  %v2131_v1 = vsel %vm370_vm0, %v354_v47, 0.0  ;;  %v2134_v3 = vsel %vm370_vm0, %v357_v48, 0.0  ;;  %v2143_v8 = vsel %vm370_vm0, %v356_v52, 0.0  ;;  %v255_v47 = vld [vmem:[%s1960_s7 + $0xa0] sm:$0xff] }
  0x30   : > { %v361_v4 = vmul.f32 %v1955_v0, %v290_v44  ;;  %v2146_v12 = vsel %vm370_vm0, %v359_v53, 0.0  ;;  %v2149_v13 = vsel %vm370_vm0, %v358_v54, 0.0  ;;  %v364_v25 = vmul.f32 %v1955_v0, %v293_v5  ;;  %v258_v53 = vld [vmem:[%s1960_s7 + $0xb8] sm:$0xff]  ;;  %v257_v54 = vld [vmem:[%s1960_s7 + $0xb0] sm:$0xff]  ;;  %v259_v5 = vld [vmem:[%s1960_s7 + $0xc0] sm:$0xff] }
  0x31   : > { %v366_v28 = vmul.f32 %v1955_v0, %v295_v7  ;;  %v2168_v29 = vsel %vm370_vm0, %v363_v20, 0.0  ;;  %v369_v32 = vmul.f32 %v1955_v0, %v298_v15  ;;  %v2183_v37 = vsel %vm370_vm0, %v367_v27, 0.0  ;;  %v262_v20 = vld [vmem:[%s1960_s7 + $0xd8] sm:$0xff]  ;;  %v264_v27 = vld [vmem:[%s1960_s7 + $0xe8] sm:$0xff] }
  0x32   : > { %v2154_v19 = vsel %vm370_vm0, %v361_v4, 0.0  ;;  %v2180_v36 = vsel %vm370_vm0, %v364_v25, 0.0  ;;  %v368_v39 = vmul.f32 %v1955_v0, %v297_v22  ;;  %v326_v52 = vmul.f32 %v1955_v0, %v255_v47  ;;  %v260_v4 = vld [vmem:[%s1960_s7 + $0xc8] sm:$0xff] }
  0x33   : > { %405 = vadd.xlane.f32.xlu1 %v404_v49  ;;  %402 = vadd.xlane.f32.xlu0 %v401_v50  ;;  %v289_v49 = vld [vmem:[%s1960_s7 + $0x1b0] sm:$0xff]  ;;  %v2119_v50 = vsel %vm370_vm0, %v352_v43, 0.0  ;;  %v2186_v38 = vsel %vm370_vm0, %v366_v28, 0.0  ;;  %v422_v43 = vsel %vm370_vm0, %v2025_v57, 0.0  ;;  %v2195_v44 = vsel %vm370_vm0, %v369_v32, 0.0  ;;  %v263_v28 = vld [vmem:[%s1960_s7 + $0xe0] sm:$0xff] }
  0x34   : > { %v360_v14 = vmul.f32 %v1955_v0, %v289_v49  ;;  %v2200_v48 = vsel %vm370_vm0, %v368_v39, 0.0  ;;  %v428_v57 = vsel %vm370_vm0, %v2032_v60, 0.0  ;;  %v328_v60 = vmul.f32 %v1955_v0, %v257_v54 }
  0x35   : > { %v330_v15 = vmul.f32 %v1955_v0, %v259_v5 }
  0x36   : > { %v2162_v24 = vsel %vm370_vm0, %v360_v14, 0.0  ;;  %v437_v7 = vsel %vm370_vm0, %v328_v60, 0.0  ;;  %v331_v14 = vmul.f32 %v1955_v0, %v260_v4 }
  0x37   : > { %411 = vadd.xlane.f32.xlu1 %v2013_v51  ;;  %408 = vadd.xlane.f32.xlu0 %v2019_v55  ;;  %v362_v51 = vmul.f32 %v1955_v0, %v291_v61  ;;  %v365_v55 = vmul.f32 %v1955_v0, %v294_v62  ;;  %v431_v61 = vsel %vm370_vm0, %v326_v52, 0.0  ;;  %v329_v62 = vmul.f32 %v1955_v0, %v258_v53 }
  0x38   : > { %v443_v22 = vsel %vm370_vm0, %v330_v15, 0.0 }
  0x39   : > { %v2171_v30 = vsel %vm370_vm0, %v362_v51, 0.0  ;;  %v2174_v31 = vsel %vm370_vm0, %v365_v55, 0.0  ;;  %v440_v6 = vsel %vm370_vm0, %v329_v62, 0.0  ;;  %v261_v51 = vld [vmem:[%s1960_s7 + $0xd0] sm:$0xff]  ;;  %v446_v55 = vsel %vm370_vm0, %v331_v14, 0.0 }
  0x3a   : > { %v332_v25 = vmul.f32 %v1955_v0, %v261_v51 }
  0x3b   : > { %417 = vadd.xlane.f32.xlu1 %v2022_v56  ;;  %414 = vadd.xlane.f32.xlu0 %v2039_v2  ;;  %v419_v56 = vsel %vm370_vm0, %v2028_v58, 0.0  ;;  %v324_v2 = vmul.f32 %v1955_v0, %v253_v23  ;;  %v327_v58 = vmul.f32 %v1955_v0, %v256_v46  ;;  %v333_v23 = vmul.f32 %v1955_v0, %v262_v20  ;;  %v265_v46 = vld [vmem:[%s1960_s7 + $0xf0] sm:$0xff] }
  0x3c   : > { %v449_v39 = vsel %vm370_vm0, %v332_v25, 0.0 }
  0x3d   : > { %v425_v49 = vsel %vm370_vm0, %v324_v2, 0.0  ;;  %v434_v59 = vsel %vm370_vm0, %v327_v58, 0.0  ;;  %v452_v32 = vsel %vm370_vm0, %v333_v23, 0.0  ;;  %v266_v2 = vld [vmem:[%s1960_s7 + $0xf8] sm:$0xff]  ;;  %v336_v58 = vmul.f32 %v1955_v0, %v265_v46  ;;  %s2713_s7 = scalar_lea.hbm %s2757_s4, %s1764_s29 }
  0x3f   : > { %423 = vadd.xlane.f32.xlu1 %v422_v43  ;;  %420 = vadd.xlane.f32.xlu0 %v419_v56  ;;  %v335_v43 = vmul.f32 %v1955_v0, %v264_v27  ;;  %v334_v56 = vmul.f32 %v1955_v0, %v263_v28  ;;  %v461_v53 = vsel %vm370_vm0, %v336_v58, 0.0 }
  0x41   : > { %v458_v47 = vsel %vm370_vm0, %v335_v43, 0.0 }
  0x43   : > { %429 = vadd.xlane.f32.xlu1 %v428_v57  ;;  %426 = vadd.xlane.f32.xlu0 %v425_v49  ;;  %v455_v57 = vsel %vm370_vm0, %v334_v56, 0.0  ;;  %v337_v49 = vmul.f32 %v1955_v0, %v266_v2  ;;  %v2758_v0 = vlaneseq }
  0x45   : > { %v464_v52 = vsel %vm370_vm0, %v337_v49, 0.0  ;;  %vm1642_vm0 = vcmask 7168  }
  0x47   : > { %435 = vadd.xlane.f32.xlu1 %v434_v59  ;;  %432 = vadd.xlane.f32.xlu0 %v431_v61 }
  0x4b   : > { %441 = vadd.xlane.f32.xlu1 %v440_v6  ;;  %438 = vadd.xlane.f32.xlu0 %v437_v7 }
  0x4f   : > { %447 = vadd.xlane.f32.xlu1 %v446_v55  ;;  %444 = vadd.xlane.f32.xlu0 %v443_v22 }
  0x53   : > { %453 = vadd.xlane.f32.xlu1 %v452_v32  ;;  %450 = vadd.xlane.f32.xlu0 %v449_v39 }
  0x57   : > { %459 = vadd.xlane.f32.xlu1 %v458_v47  ;;  %456 = vadd.xlane.f32.xlu0 %v455_v57 }
  0x5b   : > { %465 = vadd.xlane.f32.xlu1 %v464_v52  ;;  %462 = vadd.xlane.f32.xlu0 %v461_v53 }
  0x5f   : > { %471 = vadd.xlane.f32.xlu1 %v2048_v9  ;;  %468 = vadd.xlane.f32.xlu0 %v2051_v10  ;;  %v2277_v9 = vshrl.u32 %v2758_v0, 7 }
  0x61   : > { %2763 = vst [vmem:[#allocation5_spill] sm:$0xff] %v2277_v9  ;;  %v567_v10 = vsub.s32 0, %v2277_v9  ;;  %v707_v4 = vsub.s32 4, %v2277_v9  ;;  %v742_v20 = vsub.s32 5, %v2277_v9  ;;  %v777_v27 = vsub.s32 6, %v2277_v9 }
  0x62   : > { %v812_v47 = vsub.s32 7, %v2277_v9 }
  0x63   : > { %477 = vadd.xlane.f32.xlu1 %v2054_v11  ;;  %474 = vadd.xlane.f32.xlu0 %v2061_v16  ;;  %v2285_v11 = vld [vmem:[%s234_s12] sm:$0xff] }
  0x64   : > { %v568_v16 = vrot.slane %v2285_v11, %v567_v10  ;;  %v708_v7 = vrot.slane %v2285_v11, %v707_v4  ;;  %v743_v22 = vrot.slane %v2285_v11, %v742_v20  ;;  %v778_v39 = vrot.slane %v2285_v11, %v777_v27 }
  0x65   : > { %v813_v58 = vrot.slane %v2285_v11, %v812_v47 }
  0x67   : > { %483 = vadd.xlane.f32.xlu1 %v2064_v17  ;;  %480 = vadd.xlane.f32.xlu0 %v2067_v18 }
  0x6b   : > { %489 = vadd.xlane.f32.xlu1 %v2072_v21  ;;  %486 = vadd.xlane.f32.xlu0 %v2079_v26 }
  0x6f   : > { %495 = vadd.xlane.f32.xlu1 %v2088_v33  ;;  %492 = vadd.xlane.f32.xlu0 %v2091_v34  ;;  %v1876_v33 = vmov 0  }
  0x70   : > { %1810 = vset.pattern.permute.xlu0 %v1876_v33  ;;  %1811 = vset.pattern.permute.xlu1 %v1876_v33 }
  0x73   : > { %501 = vadd.xlane.f32.xlu1 %v2094_v35  ;;  %498 = vadd.xlane.f32.xlu0 %v2101_v40  ;;  %v602_v40 = vsub.s32 1, %v2277_v9 }
  0x77   : > { %507 = vadd.xlane.f32.xlu1 %v2104_v41  ;;  %504 = vadd.xlane.f32.xlu0 %v2107_v42 }
  0x7b   : > { %513 = vadd.xlane.f32.xlu1 %v2112_v45  ;;  %510 = vadd.xlane.f32.xlu0 %v2119_v50  ;;  %v603_v45 = vrot.slane %v2285_v11, %v602_v40 }
  0x7f   : > { %519 = vadd.xlane.f32.xlu1 %v2128_v63  ;;  %516 = vadd.xlane.f32.xlu0 %v2131_v1 }
  0x83   : > { %525 = vadd.xlane.f32.xlu1 %v2134_v3  ;;  %522 = vadd.xlane.f32.xlu0 %v2143_v8 }
  0x87   : > { %531 = vadd.xlane.f32.xlu1 %v2146_v12  ;;  %528 = vadd.xlane.f32.xlu0 %v2149_v13  ;;  %v637_v13 = vsub.s32 2, %v2277_v9 }
  0x8b   : > { %537 = vadd.xlane.f32.xlu1 %v2154_v19  ;;  %534 = vadd.xlane.f32.xlu0 %v2162_v24 }
  0x8f   : > { %543 = vadd.xlane.f32.xlu1 %v2168_v29  ;;  %540 = vadd.xlane.f32.xlu0 %v2171_v30  ;;  %v638_v29 = vrot.slane %v2285_v11, %v637_v13 }
  0x93   : > { %549 = vadd.xlane.f32.xlu1 %v2174_v31  ;;  %546 = vadd.xlane.f32.xlu0 %v2180_v36 }
  0x97   : > { %555 = vadd.xlane.f32.xlu1 %v2183_v37  ;;  %552 = vadd.xlane.f32.xlu0 %v2186_v38 }
  0x9b   : > { %561 = vadd.xlane.f32.xlu1 %v2195_v44  ;;  %558 = vadd.xlane.f32.xlu0 %v2200_v48  ;;  %v672_v48 = vsub.s32 3, %v2277_v9 }
  0x9d   : > { %v673_v61 = vrot.slane %v2285_v11, %v672_v48 }
  0xac   : > { %v2288_v17 = vpop.xlane.xlu1 %378  ;;  %v2290_v18 = vpop.xlane.xlu0 %372  ;;  %574 = vbcast.lane.b32.xlu1 %v568_v16, 264 }
  0xb0   : > { %v2292_v21 = vpop.xlane.xlu1 %381  ;;  %v2294_v26 = vpop.xlane.xlu0 %375  ;;  %578 = vbcast.lane.b32.xlu1 %v568_v16, 272 }
  0xb1   : > { %570 = vbcast.lane.b32.xlu0 %v568_v16, 256 }
  0xb4   : > { %v2296_v34 = vpop.xlane.xlu1 %387  ;;  %v2298_v35 = vpop.xlane.xlu0 %384  ;;  %582 = vbcast.lane.b32.xlu1 %v568_v16, 280 }
  0xb5   : > { %586 = vbcast.lane.b32.xlu0 %v568_v16, 288 }
  0xb8   : > { %v2301_v41 = vpop.xlane.xlu1 %393  ;;  %v2303_v42 = vpop.xlane.xlu0 %390  ;;  %590 = vbcast.lane.b32.xlu1 %v568_v16, 296 }
  0xb9   : > { %594 = vbcast.lane.b32.xlu0 %v568_v16, 304 }
  0xbc   : > { %v2306_v50 = vpop.xlane.xlu1 %399  ;;  %v2308_v63 = vpop.xlane.xlu0 %396  ;;  %598 = vbcast.lane.b32.xlu1 %v568_v16, 312 }
  0xbd   : > { %605 = vbcast.lane.b32.xlu0 %v603_v45, 256 }
  0xc0   : > { %v2310_v1 = vpop.xlane.xlu1 %405  ;;  %v2312_v3 = vpop.xlane.xlu0 %402  ;;  %609 = vbcast.lane.b32.xlu1 %v603_v45, 264 }
  0xc1   : > { %613 = vbcast.lane.b32.xlu0 %v603_v45, 272 }
  0xc4   : > { %v2314_v8 = vpop.xlane.xlu1 %411  ;;  %v2316_v12 = vpop.xlane.xlu0 %408  ;;  %617 = vbcast.lane.b32.xlu1 %v603_v45, 280 }
  0xc5   : > { %621 = vbcast.lane.b32.xlu0 %v603_v45, 288 }
  0xc8   : > { %v2319_v19 = vpop.xlane.xlu1 %417  ;;  %v2321_v24 = vpop.xlane.xlu0 %414  ;;  %625 = vbcast.lane.b32.xlu1 %v603_v45, 296 }
  0xc9   : > { %629 = vbcast.lane.b32.xlu0 %v603_v45, 304 }
  0xcc   : > { %v2324_v30 = vpop.xlane.xlu1 %423  ;;  %v2326_v31 = vpop.xlane.xlu0 %420  ;;  %633 = vbcast.lane.b32.xlu1 %v603_v45, 312 }
  0xcd   : > { %640 = vbcast.lane.b32.xlu0 %v638_v29, 256 }
  0xd0   : > { %v2328_v36 = vpop.xlane.xlu1 %429  ;;  %v2330_v37 = vpop.xlane.xlu0 %426  ;;  %644 = vbcast.lane.b32.xlu1 %v638_v29, 264 }
  0xd1   : > { %648 = vbcast.lane.b32.xlu0 %v638_v29, 272 }
  0xd4   : > { %v2332_v38 = vpop.xlane.xlu1 %435  ;;  %v2334_v44 = vpop.xlane.xlu0 %432  ;;  %652 = vbcast.lane.b32.xlu1 %v638_v29, 280 }
  0xd5   : > { %656 = vbcast.lane.b32.xlu0 %v638_v29, 288 }
  0xd8   : > { %v2337_v54 = vpop.xlane.xlu1 %441  ;;  %v2339_v59 = vpop.xlane.xlu0 %438  ;;  %660 = vbcast.lane.b32.xlu1 %v638_v29, 296 }
  0xd9   : > { %664 = vbcast.lane.b32.xlu0 %v638_v29, 304 }
  0xdc   : > { %v2342_v62 = vpop.xlane.xlu1 %447  ;;  %v2344_v60 = vpop.xlane.xlu0 %444  ;;  %668 = vbcast.lane.b32.xlu1 %v638_v29, 312 }
  0xdd   : > { %675 = vbcast.lane.b32.xlu0 %v673_v61, 256 }
  0xe0   : > { %v2347_v5 = vpop.xlane.xlu1 %453  ;;  %v2349_v6 = vpop.xlane.xlu0 %450  ;;  %679 = vbcast.lane.b32.xlu1 %v673_v61, 264 }
  0xe1   : > { %683 = vbcast.lane.b32.xlu0 %v673_v61, 272 }
  0xe4   : > { %v2352_v14 = vpop.xlane.xlu1 %459  ;;  %v2354_v15 = vpop.xlane.xlu0 %456  ;;  %710 = vbcast.lane.b32.xlu1 %v708_v7, 256 }
  0xe5   : > { %714 = vbcast.lane.b32.xlu0 %v708_v7, 264 }
  0xe8   : > { %v2357_v51 = vpop.xlane.xlu1 %465  ;;  %v2359_v55 = vpop.xlane.xlu0 %462  ;;  %687 = vbcast.lane.b32.xlu1 %v673_v61, 280 }
  0xe9   : > { %2764 = vst [vmem:[#allocation6_spill] sm:$0xff] %v2357_v51  ;;  %718 = vbcast.lane.b32.xlu0 %v708_v7, 272 }
  0xec   : > { %v2362_v23 = vpop.xlane.xlu1 %471  ;;  %v2364_v25 = vpop.xlane.xlu0 %468  ;;  %745 = vbcast.lane.b32.xlu1 %v743_v22, 256 }
  0xed   : > { %749 = vbcast.lane.b32.xlu0 %v743_v22, 264 }
  0xf0   : > { %v2367_v28 = vpop.xlane.xlu1 %477  ;;  %v2369_v32 = vpop.xlane.xlu0 %474  ;;  %691 = vbcast.lane.b32.xlu1 %v673_v61, 288 }
  0xf1   : > { %722 = vbcast.lane.b32.xlu0 %v708_v7, 280 }
  0xf4   : > { %v2372_v43 = vpop.xlane.xlu1 %483  ;;  %v2374_v56 = vpop.xlane.xlu0 %480  ;;  %753 = vbcast.lane.b32.xlu1 %v743_v22, 272 }
  0xf5   : > { %780 = vbcast.lane.b32.xlu0 %v778_v39, 256 }
  0xf8   : > { %v2376_v2 = vpop.xlane.xlu1 %489  ;;  %v2378_v46 = vpop.xlane.xlu0 %486  ;;  %784 = vbcast.lane.b32.xlu1 %v778_v39, 264 }
  0xf9   : > { %2765 = vst [vmem:[#allocation7_spill] sm:$0xff] %v2376_v2  ;;  %2766 = vst [vmem:[#allocation8_spill] sm:$0xff] %v2378_v46  ;;  %695 = vbcast.lane.b32.xlu0 %v673_v61, 296 }
  0xfc   : > { %v2381_v57 = vpop.xlane.xlu1 %495  ;;  %v2383_v49 = vpop.xlane.xlu0 %492  ;;  %726 = vbcast.lane.b32.xlu1 %v708_v7, 288 }
  0xfd   : > { %757 = vbcast.lane.b32.xlu0 %v743_v22, 280 }
 0x100   : > { %v2386_v52 = vpop.xlane.xlu1 %501  ;;  %v2388_v53 = vpop.xlane.xlu0 %498  ;;  %788 = vbcast.lane.b32.xlu1 %v778_v39, 272 }
 0x101   : > { %815 = vbcast.lane.b32.xlu0 %v813_v58, 256 }
 0x104   : > { %v2390_v10 = vpop.xlane.xlu1 %507  ;;  %v2392_v16 = vpop.xlane.xlu0 %504  ;;  %819 = vbcast.lane.b32.xlu1 %v813_v58, 264 }
 0x105   : > { %2767 = vst [vmem:[#allocation9_spill] sm:$0xff] %v2390_v10  ;;  %2768 = vst [vmem:[#allocation10_spill] sm:$0xff] %v2392_v16  ;;  %699 = vbcast.lane.b32.xlu0 %v673_v61, 304 }
 0x108   : > { %v2394_v33 = vpop.xlane.xlu1 %513  ;;  %v2396_v40 = vpop.xlane.xlu0 %510  ;;  %730 = vbcast.lane.b32.xlu1 %v708_v7, 296 }
 0x109   : > { %2769 = vst [vmem:[#allocation11_spill] sm:$0xff] %v2394_v33  ;;  %2770 = vst [vmem:[#allocation12_spill] sm:$0xff] %v2396_v40  ;;  %761 = vbcast.lane.b32.xlu0 %v743_v22, 288 }
 0x10c   : > { %v2398_v45 = vpop.xlane.xlu1 %519  ;;  %v2400_v11 = vpop.xlane.xlu0 %516  ;;  %792 = vbcast.lane.b32.xlu1 %v778_v39, 280 }
 0x10d   : > { %823 = vbcast.lane.b32.xlu0 %v813_v58, 272 }
 0x110   : > { %v2402_v13 = vpop.xlane.xlu1 %525  ;;  %v2404_v29 = vpop.xlane.xlu0 %522  ;;  %703 = vbcast.lane.b32.xlu1 %v673_v61, 312 }
 0x111   : > { %734 = vbcast.lane.b32.xlu0 %v708_v7, 304 }
 0x114   : > { %v2406_v48 = vpop.xlane.xlu1 %531  ;;  %v2408_v4 = vpop.xlane.xlu0 %528  ;;  %765 = vbcast.lane.b32.xlu1 %v743_v22, 296 }
 0x115   : > { %2771 = vst [vmem:[#allocation13_spill] sm:$0xff] %v2406_v48  ;;  %2772 = vst [vmem:[#allocation14_spill] sm:$0xff] %v2408_v4  ;;  %796 = vbcast.lane.b32.xlu0 %v778_v39, 288 }
 0x118   : > { %v2410_v20 = vpop.xlane.xlu1 %537  ;;  %v2412_v27 = vpop.xlane.xlu0 %534  ;;  %827 = vbcast.lane.b32.xlu1 %v813_v58, 280 }
 0x119   : > { %2773 = vst [vmem:[#allocation15_spill] sm:$0xff] %v2410_v20  ;;  %2774 = vst [vmem:[#allocation16_spill] sm:$0xff] %v2412_v27  ;;  %738 = vbcast.lane.b32.xlu0 %v708_v7, 312 }
 0x11c   : > { %v2414_v47 = vpop.xlane.xlu1 %543  ;;  %v2416_v0 = vpop.xlane.xlu0 %540  ;;  %769 = vbcast.lane.b32.xlu1 %v743_v22, 304 }
 0x11d   : > { %800 = vbcast.lane.b32.xlu0 %v778_v39, 296 }
 0x120   : > { %v2418_v61 = vpop.xlane.xlu1 %549  ;;  %v2420_v33 = vpop.xlane.xlu0 %546  ;;  %831 = vbcast.lane.b32.xlu1 %v813_v58, 288 }
 0x121   : > { %2775 = vst [vmem:[#allocation17_spill] sm:$0xff] %v2418_v61  ;;  %2776 = vst [vmem:[#allocation18_spill] sm:$0xff] %v2420_v33  ;;  %773 = vbcast.lane.b32.xlu0 %v743_v22, 312 }
 0x124   : > { %v2422_v48 = vpop.xlane.xlu1 %555  ;;  %v2424_v2 = vpop.xlane.xlu0 %552  ;;  %804 = vbcast.lane.b32.xlu1 %v778_v39, 304 }
 0x125   : > { %2777 = vst [vmem:[#allocation19_spill] sm:$0xff] %v2422_v48  ;;  %2778 = vst [vmem:[#allocation20_spill] sm:$0xff] %v2424_v2  ;;  %835 = vbcast.lane.b32.xlu0 %v813_v58, 296 }
 0x128   : > { %v2426_v20 = vpop.xlane.xlu1 %561  ;;  %v2428_v7 = vpop.xlane.xlu0 %558  ;;  %808 = vbcast.lane.b32.xlu1 %v778_v39, 312 }
 0x129   : > { %2779 = vst [vmem:[#allocation21_spill] sm:$0xff] %v2426_v20  ;;  %2780 = vst [vmem:[#allocation22_spill] sm:$0xff] %v2428_v7  ;;  %839 = vbcast.lane.b32.xlu0 %v813_v58, 304 }
 0x12c   : > { %v575_v27 = vpop.permute.xlu1 %574  ;;  %v571_v40 = vpop.permute.xlu0 %570  ;;  %843 = vbcast.lane.b32.xlu1 %v813_v58, 312 }
 0x12d   : > { %v910_v4 = vsub.f32 %v2294_v26, %v575_v27  ;;  %v909_v9 = vsub.f32 %v2290_v18, %v571_v40 }
 0x12f   : > { %v974_v22 = vmul.f32 %v910_v4, %v910_v4  ;;  %v973_v61 = vmul.f32 %v909_v9, %v909_v9 }
 0x130   : > { %v579_v48 = vpop.permute.xlu1 %578  ;;  %v587_v46 = vpop.permute.xlu0 %586 }
 0x131   : > { %1105 = vperm.xlu1 %1811, %v974_v22   ;;  %1102 = vperm.xlu0 %1810, %v973_v61   ;;  %v911_v58 = vsub.f32 %v2288_v17, %v579_v48 }
 0x133   : > { %v975_v9 = vmul.f32 %v911_v58, %v911_v58 }
 0x134   : > { %v583_v2 = vpop.permute.xlu1 %582  ;;  %v2432_v10 = vpop.permute.xlu0 %594 }
 0x138   : > { %v2434_v20 = vpop.permute.xlu1 %590  ;;  %v606_v39 = vpop.permute.xlu0 %605 }
 0x139   : > { %v917_v7 = vsub.f32 %v2308_v63, %v606_v39 }
 0x13b   : > { %v981_v33 = vmul.f32 %v917_v7, %v917_v7 }
 0x13c   : > { %v2438_v26 = vpop.permute.xlu1 %598  ;;  %v614_v18 = vpop.permute.xlu0 %613 }
 0x13d   : > { %1126 = vperm.xlu1 %1811, %v981_v33   ;;  %v919_v61 = vsub.f32 %v2312_v3, %v614_v18  ;;  %v912_v33 = vsub.f32 %v2292_v21, %v583_v2 }
 0x13f   : > { %v983_v63 = vmul.f32 %v919_v61, %v919_v61 }
 0x140   : > { %v610_v40 = vpop.permute.xlu1 %609  ;;  %v622_v4 = vpop.permute.xlu0 %621 }
 0x141   : > { %v918_v27 = vsub.f32 %v2306_v50, %v610_v40  ;;  %1108 = vperm.xlu1 %1811, %v975_v9   ;;  %v976_v9 = vmul.f32 %v912_v33, %v912_v33  ;;  %v913_v33 = vsub.f32 %v2298_v35, %v587_v46  ;;  %v914_v46 = vsub.f32 %v2296_v34, %v2434_v20 }
 0x143   : > { %v982_v22 = vmul.f32 %v918_v27, %v918_v27 }
 0x144   : > { %v618_v51 = vpop.permute.xlu1 %617  ;;  %v2442_v16 = vpop.permute.xlu0 %629 }
 0x145   : > { %1129 = vperm.xlu0 %1810, %v982_v22   ;;  %v920_v61 = vsub.f32 %v2310_v1, %v618_v51  ;;  %v977_v51 = vmul.f32 %v913_v33, %v913_v33 }
 0x147   : > { %v984_v21 = vmul.f32 %v920_v61, %v920_v61 }
 0x148   : > { %v626_v17 = vpop.permute.xlu1 %625  ;;  %v641_v48 = vpop.permute.xlu0 %640 }
 0x149   : > { %v925_v7 = vsub.f32 %v2326_v31, %v641_v48  ;;  %1132 = vperm.xlu0 %1810, %v983_v63   ;;  %v922_v34 = vsub.f32 %v2314_v8, %v626_v17  ;;  %v923_v8 = vsub.f32 %v2321_v24, %v2442_v16 }
 0x14b   : > { %v989_v39 = vmul.f32 %v925_v7, %v925_v7 }
 0x14c   : > { %v2446_v58 = vpop.permute.xlu1 %633  ;;  %v649_v50 = vpop.permute.xlu0 %648 }
 0x14d   : > { %1150 = vperm.xlu1 %1811, %v989_v39   ;;  %v927_v3 = vsub.f32 %v2330_v37, %v649_v50 }
 0x14f   : > { %v991_v22 = vmul.f32 %v927_v3, %v927_v3 }
 0x150   : > { %v645_v18 = vpop.permute.xlu1 %644  ;;  %v657_v40 = vpop.permute.xlu0 %656 }
 0x151   : > { %v926_v27 = vsub.f32 %v2324_v30, %v645_v18  ;;  %1111 = vperm.xlu1 %1811, %v976_v9  }
 0x153   : > { %v990_v31 = vmul.f32 %v926_v27, %v926_v27  ;;  %v921_v27 = vsub.f32 %v2316_v12, %v622_v4  ;;  %v978_v12 = vmul.f32 %v914_v46, %v914_v46  ;;  %v929_v4 = vsub.f32 %v2334_v44, %v657_v40 }
 0x154   : > { %v653_v63 = vpop.permute.xlu1 %652  ;;  %v2451_v48 = vpop.permute.xlu0 %664 }
 0x155   : > { %1153 = vperm.xlu0 %1810, %v990_v31   ;;  %1156 = vperm.xlu1 %1811, %v991_v22   ;;  %v928_v50 = vsub.f32 %v2328_v36, %v653_v63  ;;  %v993_v20 = vmul.f32 %v929_v4, %v929_v4 }
 0x157   : > { %v992_v61 = vmul.f32 %v928_v50, %v928_v50 }
 0x158   : > { %v2453_v2 = vpop.permute.xlu1 %660  ;;  %v676_v7 = vpop.permute.xlu0 %675 }
 0x159   : > { %v933_v37 = vsub.f32 %v2344_v60, %v676_v7  ;;  %1135 = vperm.xlu0 %1810, %v984_v21   ;;  %v985_v21 = vmul.f32 %v921_v27, %v921_v27  ;;  %v930_v16 = vsub.f32 %v2332_v38, %v2453_v2  ;;  %v924_v38 = vsub.f32 %v2319_v19, %v2446_v58 }
 0x15b   : > { %v997_v30 = vmul.f32 %v933_v37, %v933_v37 }
 0x15c   : > { %v2457_v39 = vpop.permute.xlu1 %668  ;;  %v684_v1 = vpop.permute.xlu0 %683 }
 0x15d   : > { %1174 = vperm.xlu0 %1810, %v997_v30   ;;  %v935_v36 = vsub.f32 %v2349_v6, %v684_v1 }
 0x15f   : > { %v999_v37 = vmul.f32 %v935_v36, %v935_v36 }
 0x160   : > { %v680_v9 = vpop.permute.xlu1 %679  ;;  %v715_v3 = vpop.permute.xlu0 %714 }
 0x161   : > { %v934_v18 = vsub.f32 %v2342_v62, %v680_v9  ;;  %1114 = vperm.xlu0 %1810, %v977_v51   ;;  %v942_v33 = vsub.f32 %v2362_v23, %v715_v3  ;;  %v986_v9 = vmul.f32 %v922_v34, %v922_v34 }
 0x163   : > { %v998_v60 = vmul.f32 %v934_v18, %v934_v18  ;;  %v1006_v51 = vmul.f32 %v942_v33, %v942_v33 }
 0x164   : > { %v711_v22 = vpop.permute.xlu1 %710  ;;  %v719_v31 = vpop.permute.xlu0 %718 }
 0x165   : > { %v941_v35 = vsub.f32 %v2364_v25, %v711_v22  ;;  %1177 = vperm.xlu1 %1811, %v998_v60   ;;  %1159 = vperm.xlu0 %1810, %v992_v61   ;;  %v943_v6 = vsub.f32 %v2369_v32, %v719_v31  ;;  %v987_v22 = vmul.f32 %v923_v8, %v923_v8 }
 0x167   : > { %v1005_v63 = vmul.f32 %v941_v35, %v941_v35  ;;  %v1007_v18 = vmul.f32 %v943_v6, %v943_v6 }
 0x168   : > { %v688_v7 = vpop.permute.xlu1 %687  ;;  %v750_v62 = vpop.permute.xlu0 %749 }
 0x169   : > { %1138 = vperm.xlu1 %1811, %v985_v21   ;;  %1198 = vperm.xlu0 %1810, %v1005_v63   ;;  %v936_v44 = vsub.f32 %v2347_v5, %v688_v7  ;;  %v950_v23 = vsub.f32 %v2381_v57, %v750_v62  ;;  %v915_v5 = vsub.f32 %v2303_v42, %v2432_v10 }
 0x16a   : > { %v994_v42 = vmul.f32 %v930_v16, %v930_v16  ;;  %v2784_v16 = vld [vmem:[#allocation18_spill] sm:$0xff] }
 0x16b   : > { %v1000_v17 = vmul.f32 %v936_v44, %v936_v44  ;;  %v1014_v27 = vmul.f32 %v950_v23, %v950_v23  ;;  %v979_v24 = vmul.f32 %v915_v5, %v915_v5  ;;  %v2781_v5 = vld [vmem:[#allocation10_spill] sm:$0xff] }
 0x16c   : > { %v746_v25 = vpop.permute.xlu1 %745  ;;  %v723_v30 = vpop.permute.xlu0 %722 }
 0x16d   : > { %1117 = vperm.xlu0 %1810, %v978_v12   ;;  %1180 = vperm.xlu1 %1811, %v999_v37   ;;  %v949_v32 = vsub.f32 %v2383_v49, %v746_v25  ;;  %v944_v10 = vsub.f32 %v2367_v28, %v723_v30  ;;  %v916_v28 = vsub.f32 %v2301_v41, %v2438_v26 }
 0x16e   : > { %v988_v25 = vmul.f32 %v924_v38, %v924_v38 }
 0x16f   : > { %v1013_v57 = vmul.f32 %v949_v32, %v949_v32  ;;  %v1008_v2 = vmul.f32 %v944_v10, %v944_v10  ;;  %v980_v19 = vmul.f32 %v916_v28, %v916_v28  ;;  %v2789_v28 = vld [vmem:[#allocation14_spill] sm:$0xff] }
 0x170   : > { %v692_v1 = vpop.permute.xlu1 %691  ;;  %v781_v50 = vpop.permute.xlu0 %780 }
 0x171   : > { %1162 = vperm.xlu0 %1810, %v993_v20   ;;  %1201 = vperm.xlu1 %1811, %v1006_v51   ;;  %v937_v31 = vsub.f32 %v2354_v15, %v692_v1 }
 0x173   : > { %v1001_v49 = vmul.f32 %v937_v31, %v937_v31 }
 0x174   : > { %v754_v40 = vpop.permute.xlu1 %753  ;;  %v696_v3 = vpop.permute.xlu0 %695 }
 0x175   : > { %1141 = vperm.xlu1 %1811, %v986_v9   ;;  %1204 = vperm.xlu0 %1810, %v1007_v18   ;;  %v951_v21 = vsub.f32 %v2388_v53, %v754_v40  ;;  %v957_v53 = vsub.f32 %v2400_v11, %v781_v50  ;;  %v938_v30 = vsub.f32 %v2352_v14, %v696_v3 }
 0x176   : > { %v931_v11 = vsub.f32 %v2339_v59, %v2451_v48  ;;  %v932_v59 = vsub.f32 %v2337_v54, %v2457_v39 }
 0x177   : > { %v1015_v7 = vmul.f32 %v951_v21, %v951_v21  ;;  %v1002_v58 = vmul.f32 %v938_v30, %v938_v30  ;;  %v2785_v21 = vld [vmem:[#allocation9_spill] sm:$0xff] }
 0x178   : > { %v785_v61 = vpop.permute.xlu1 %784  ;;  %v758_v60 = vpop.permute.xlu0 %757  ;;  %v995_v41 = vmul.f32 %v931_v11, %v931_v11  ;;  %v996_v3 = vmul.f32 %v932_v59, %v932_v59 }
 0x179   : > { %1183 = vperm.xlu1 %1811, %v1000_v17   ;;  %1225 = vperm.xlu0 %1810, %v1014_v27   ;;  %v958_v15 = vsub.f32 %v2398_v45, %v785_v61  ;;  %v1021_v45 = vmul.f32 %v957_v53, %v957_v53  ;;  %v952_v51 = vsub.f32 %v2386_v52, %v758_v60 }
 0x17b   : > { %v1022_v4 = vmul.f32 %v958_v15, %v958_v15  ;;  %v1016_v26 = vmul.f32 %v952_v51, %v952_v51 }
 0x17c   : > { %v727_v35 = vpop.permute.xlu1 %726  ;;  %v816_v46 = vpop.permute.xlu0 %815 }
 0x17d   : > { %1222 = vperm.xlu1 %1811, %v1013_v57   ;;  %1144 = vperm.xlu0 %1810, %v987_v22   ;;  %v945_v50 = vsub.f32 %v2374_v56, %v727_v35  ;;  %v965_v14 = vsub.f32 %v2416_v0, %v816_v46  ;;  %v2783_v35 = vlaneseq }
 0x17f   : > { %v1009_v48 = vmul.f32 %v945_v50, %v945_v50  ;;  %v1029_v52 = vmul.f32 %v965_v14, %v965_v14  ;;  %v2506_v46 = vand.u32 127, %v2783_v35  ;;  %v2792_v14 = vld [vmem:[#allocation20_spill] sm:$0xff] }
 0x180   : > { %v789_v36 = vpop.permute.xlu1 %788  ;;  %v700_v63 = vpop.permute.xlu0 %699 }
 0x181   : > { %1120 = vperm.xlu1 %1811, %v979_v24   ;;  %1186 = vperm.xlu0 %1810, %v1001_v49   ;;  %v959_v44 = vsub.f32 %v2404_v29, %v789_v36  ;;  %v939_v27 = vsub.f32 %v2359_v55, %v700_v63 }
 0x183   : > { %v1023_v56 = vmul.f32 %v959_v44, %v959_v44  ;;  %v1003_v60 = vmul.f32 %v939_v27, %v939_v27  ;;  %v2796_v27 = vld [vmem:[#allocation15_spill] sm:$0xff] }
 0x184   : > { %v820_v62 = vpop.permute.xlu1 %819  ;;  %v762_v12 = vpop.permute.xlu0 %761 }
 0x185   : > { %1165 = vperm.xlu1 %1811, %v994_v42   ;;  %1228 = vperm.xlu0 %1810, %v1015_v7   ;;  %v966_v0 = vsub.f32 %v2414_v47, %v820_v62  ;;  %v953_v22 = vsub.f32 %v2781_v5, %v762_v12  ;;  %v2782_v47 = vld [vmem:[#allocation6_spill] sm:$0xff]  ;;  %v1299_v42 = vadd.s32 4294967288, %v2506_v46  ;;  %v2786_v7 = vld [vmem:[#allocation8_spill] sm:$0xff]  ;;  %v2787_v12 = vld [vmem:[#allocation17_spill] sm:$0xff] }
 0x187   : > { %v1030_v54 = vmul.f32 %v966_v0, %v966_v0  ;;  %v1017_v24 = vmul.f32 %v953_v22, %v953_v22  ;;  %v2798_v22 = vld [vmem:[#allocation21_spill] sm:$0xff] }
 0x188   : > { %v731_v37 = vpop.permute.xlu1 %730  ;;  %v824_v33 = vpop.permute.xlu0 %823 }
 0x189   : > { %1249 = vperm.xlu0 %1810, %v1022_v4   ;;  %1207 = vperm.xlu1 %1811, %v1008_v2   ;;  %v946_v8 = vsub.f32 %v2372_v43, %v731_v37  ;;  %v2788_v4 = vld [vmem:[#allocation5_spill] sm:$0xff] }
 0x18a   : > { %v2514_v37 = vsub.s32 %v1299_v42, %v2788_v4 }
 0x18b   : > { %v1010_v39 = vmul.f32 %v946_v8, %v946_v8  ;;  %v2795_v8 = vld [vmem:[#allocation11_spill] sm:$0xff] }
 0x18c   : > { %v793_v34 = vpop.permute.xlu1 %792  ;;  %v735_v20 = vpop.permute.xlu0 %734 }
 0x18d   : > { %1147 = vperm.xlu0 %1810, %v988_v25   ;;  %1246 = vperm.xlu1 %1811, %v1021_v45   ;;  %v960_v32 = vsub.f32 %v2402_v13, %v793_v34  ;;  %v967_v13 = vsub.f32 %v2784_v16, %v824_v33  ;;  %v947_v15 = vsub.f32 %v2786_v7, %v735_v20  ;;  %v2790_v34 = vld [vmem:[#allocation12_spill] sm:$0xff] }
 0x18e   : > { %v2518_v33 = vsub.s32 %v2506_v46, %v2788_v4 }
 0x18f   : > { %v1024_v57 = vmul.f32 %v960_v32, %v960_v32  ;;  %v1031_v10 = vmul.f32 %v967_v13, %v967_v13  ;;  %v1011_v45 = vmul.f32 %v947_v15, %v947_v15 }
 0x190   : > { %v704_v6 = vpop.permute.xlu1 %703  ;;  %v797_v1 = vpop.permute.xlu0 %796 }
 0x191   : > { %1123 = vperm.xlu1 %1811, %v980_v19   ;;  %1189 = vperm.xlu0 %1810, %v1002_v58   ;;  %v940_v31 = vsub.f32 %v2782_v47, %v704_v6  ;;  %v961_v25 = vsub.f32 %v2789_v28, %v797_v1 }
 0x193   : > { %v1004_v49 = vmul.f32 %v940_v31, %v940_v31  ;;  %v1025_v6 = vmul.f32 %v961_v25, %v961_v25 }
 0x194   : > { %v766_v9 = vpop.permute.xlu1 %765  ;;  %v2494_v18 = vpop.permute.xlu0 %738 }
 0x195   : > { %1168 = vperm.xlu1 %1811, %v995_v41   ;;  %1231 = vperm.xlu0 %1810, %v1016_v26   ;;  %v954_v36 = vsub.f32 %v2785_v21, %v766_v9  ;;  %v2791_v41 = vld [vmem:[#allocation7_spill] sm:$0xff] }
 0x196   : > { %v948_v26 = vsub.f32 %v2791_v41, %v2494_v18 }
 0x197   : > { %v1018_v62 = vmul.f32 %v954_v36, %v954_v36 }
 0x198   : > { %v828_v23 = vpop.permute.xlu1 %827  ;;  %v801_v40 = vpop.permute.xlu0 %800  ;;  %v1012_v59 = vmul.f32 %v948_v26, %v948_v26 }
 0x199   : > { %1210 = vperm.xlu1 %1811, %v1009_v48   ;;  %1270 = vperm.xlu0 %1810, %v1029_v52   ;;  %v968_v38 = vsub.f32 %v2787_v12, %v828_v23  ;;  %v2793_v48 = vld [vmem:[#allocation13_spill] sm:$0xff]  ;;  %v2794_v23 = vld [vmem:[#allocation16_spill] sm:$0xff] }
 0x19a   : > { %v962_v52 = vsub.f32 %v2793_v48, %v801_v40 }
 0x19b   : > { %v1032_v30 = vmul.f32 %v968_v38, %v968_v38 }
 0x19c   : > { %v770_v17 = vpop.permute.xlu1 %769  ;;  %v774_v29 = vpop.permute.xlu0 %773  ;;  %v1026_v0 = vmul.f32 %v962_v52, %v962_v52 }
 0x19d   : > { %1252 = vperm.xlu1 %1811, %v1023_v56   ;;  %1171 = vperm.xlu0 %1810, %v996_v3   ;;  %v955_v20 = vsub.f32 %v2790_v34, %v770_v17  ;;  %v1306_v56 = vadd.s32 4294967280, %v2506_v46  ;;  %v956_v18 = vsub.f32 %v2795_v8, %v774_v29 }
 0x19f   : > { %v1019_v50 = vmul.f32 %v955_v20, %v955_v20  ;;  %v2534_v32 = vsub.s32 %v1306_v56, %v2788_v4  ;;  %v1020_v40 = vmul.f32 %v956_v18, %v956_v18 }
 0x1a0   : > { %v832_v61 = vpop.permute.xlu1 %831  ;;  %v836_v55 = vpop.permute.xlu0 %835 }
 0x1a1   : > { %1273 = vperm.xlu1 %1811, %v1030_v54   ;;  %1213 = vperm.xlu0 %1810, %v1010_v39   ;;  %v969_v1 = vsub.f32 %v2792_v14, %v832_v61  ;;  %v2797_v61 = vld [vmem:[#allocation19_spill] sm:$0xff] }
 0x1a3   : > { %v1033_v44 = vmul.f32 %v969_v1, %v969_v1 }
 0x1a4   : > { %v805_v43 = vpop.permute.xlu1 %804  ;;  %v840_v2 = vpop.permute.xlu0 %839 }
 0x1a5   : > { %1255 = vperm.xlu0 %1810, %v1024_v57   ;;  %1192 = vperm.xlu1 %1811, %v1003_v60   ;;  %v963_v3 = vsub.f32 %v2794_v23, %v805_v43  ;;  %v970_v60 = vsub.f32 %v2797_v61, %v836_v55  ;;  %v2799_v43 = vld [vmem:[#allocation22_spill] sm:$0xff] }
 0x1a6   : > { %v971_v35 = vsub.f32 %v2799_v43, %v840_v2 }
 0x1a7   : > { %v1027_v17 = vmul.f32 %v963_v3, %v963_v3  ;;  %v1034_v29 = vmul.f32 %v970_v60, %v970_v60 }
 0x1a8   : > { %v809_v63 = vpop.permute.xlu1 %808  ;;  %v1035_v21 = vmul.f32 %v971_v35, %v971_v35 }
 0x1a9   : > { %1195 = vperm.xlu0 %1810, %v1004_v49   ;;  %1234 = vperm.xlu1 %1811, %v1017_v24   ;;  %v964_v54 = vsub.f32 %v2796_v27, %v809_v63 }
 0x1ab   : > { %v1028_v5 = vmul.f32 %v964_v54, %v964_v54 }
 0x1ac   : > { %v844_v53 = vpop.permute.xlu1 %843 }
 0x1ad   : > { %1237 = vperm.xlu0 %1810, %v1018_v62   ;;  %1276 = vperm.xlu1 %1811, %v1031_v10   ;;  %v972_v57 = vsub.f32 %v2798_v22, %v844_v53  ;;  %v1313_v10 = vadd.s32 4294967272, %v2506_v46 }
 0x1af   : > { %v1036_v24 = vmul.f32 %v972_v57, %v972_v57  ;;  %v2548_v62 = vsub.s32 %v1313_v10, %v2788_v4 }
 0x1b0   : > { %v1106_v19 = vpop.permute.xlu1 %1105  ;;  %v1103_v11 = vpop.permute.xlu0 %1102 }
 0x1b1   : > { %v1303_v58 = vrot.slane %v1106_v19, %v2514_v37  ;;  %v1298_v51 = vrot.slane %v1103_v11, %v2518_v33  ;;  %1279 = vperm.xlu0 %1810, %v1032_v30   ;;  %1216 = vperm.xlu1 %1811, %v1011_v45  }
 0x1b3   : > { %v1305_v9 = vsel %vm1304_vm1, %v1303_v58, %v1298_v51  ;;  %v1320_v58 = vadd.s32 4294967264, %v2506_v46 }
 0x1b5   : > { %1240 = vperm.xlu0 %1810, %v1019_v50   ;;  %1258 = vperm.xlu1 %1811, %v1025_v6   ;;  %v2561_v41 = vsub.s32 %v1320_v58, %v2788_v4  ;;  %v1341_v58 = vadd.s32 4294967240, %v2506_v46 }
 0x1b9   : > { %1282 = vperm.xlu0 %1810, %v1033_v44   ;;  %1219 = vperm.xlu1 %1811, %v1012_v59   ;;  %v1327_v44 = vadd.s32 4294967256, %v2506_v46 }
 0x1bb   : > { %v2573_v18 = vsub.s32 %v1327_v44, %v2788_v4 }
 0x1bc   : > { %v1127_v39 = vpop.permute.xlu1 %1126 }
 0x1bd   : > { %1264 = vperm.xlu0 %1810, %v1027_v17   ;;  %1261 = vperm.xlu1 %1811, %v1026_v0   ;;  %v1351_v49 = vrot.slane %v1127_v39, %v2518_v33 }
 0x1c0   : > { %v1109_v47 = vpop.permute.xlu1 %1108 }
 0x1c1   : > { %v1310_v31 = vrot.slane %v1109_v47, %v2534_v32  ;;  %1267 = vperm.xlu0 %1810, %v1028_v5   ;;  %1243 = vperm.xlu1 %1811, %v1020_v40  }
 0x1c3   : > { %v1312_v16 = vsel %vm1311_vm2, %v1310_v31, %v1305_v9 }
 0x1c4   : > { %v1130_v13 = vpop.permute.xlu0 %1129 }
 0x1c5   : > { %v1355_v55 = vrot.slane %v1130_v13, %v2514_v37  ;;  %1291 = vperm.xlu0 %1810, %v1036_v24   ;;  %1285 = vperm.xlu1 %1811, %v1034_v29  }
 0x1c7   : > { %v1356_v36 = vsel %vm1304_vm1, %v1355_v55, %v1351_v49  ;;  %v1334_v49 = vadd.s32 4294967248, %v2506_v46 }
 0x1c8   : > { %v1133_v63 = vpop.permute.xlu0 %1132 }
 0x1c9   : > { %v1360_v42 = vrot.slane %v1133_v63, %v2534_v32  ;;  %1288 = vperm.xlu1 %1811, %v1035_v21   ;;  %v2594_v10 = vsub.s32 %v1334_v49, %v2788_v4 }
 0x1cb   : > { %v1361_v7 = vsel %vm1311_vm2, %v1360_v42, %v1356_v36 }
 0x1cc   : > { %v1151_v15 = vpop.permute.xlu1 %1150 }
 0x1cd   : > { %v1390_v25 = vrot.slane %v1151_v15, %v2518_v33 }
 0x1d0   : > { %v1112_v12 = vpop.permute.xlu1 %1111 }
 0x1d1   : > { %v1317_v38 = vrot.slane %v1112_v12, %v2548_v62 }
 0x1d3   : > { %v1319_v2 = vsel %vm1318_vm3, %v1317_v38, %v1312_v16 }
 0x1d4   : > { %v1157_v53 = vpop.permute.xlu1 %1156  ;;  %v1154_v28 = vpop.permute.xlu0 %1153 }
 0x1d5   : > { %v1399_v45 = vrot.slane %v1157_v53, %v2534_v32  ;;  %v1394_v30 = vrot.slane %v1154_v28, %v2514_v37 }
 0x1d7   : > { %v1395_v34 = vsel %vm1304_vm1, %v1394_v30, %v1390_v25 }
 0x1d8   : > { %v1136_v20 = vpop.permute.xlu0 %1135  ;;  %v1400_v19 = vsel %vm1311_vm2, %v1399_v45, %v1395_v34 }
 0x1d9   : > { %v1365_v11 = vrot.slane %v1136_v20, %v2548_v62 }
 0x1db   : > { %v1366_v51 = vsel %vm1318_vm3, %v1365_v11, %v1361_v7 }
 0x1dc   : > { %v1175_v6 = vpop.permute.xlu0 %1174 }
 0x1dd   : > { %v1429_v59 = vrot.slane %v1175_v6, %v2518_v33 }
 0x1e0   : > { %v1115_v26 = vpop.permute.xlu0 %1114 }
 0x1e1   : > { %v1324_v50 = vrot.slane %v1115_v26, %v2561_v41  ;;  %v2612_v26 = vsub.s32 %v1341_v58, %v2788_v4 }
 0x1e3   : > { %v1326_v14 = vsel %vm1325_vm4, %v1324_v50, %v1319_v2 }
 0x1e4   : > { %v1178_v1 = vpop.permute.xlu1 %1177  ;;  %v1160_v9 = vpop.permute.xlu0 %1159 }
 0x1e5   : > { %v1433_v48 = vrot.slane %v1178_v1, %v2514_v37  ;;  %v1404_v52 = vrot.slane %v1160_v9, %v2548_v62 }
 0x1e7   : > { %v1434_v23 = vsel %vm1304_vm1, %v1433_v48, %v1429_v59  ;;  %v1405_v3 = vsel %vm1318_vm3, %v1404_v52, %v1400_v19 }
 0x1e8   : > { %v1139_v56 = vpop.permute.xlu1 %1138  ;;  %v1199_v0 = vpop.permute.xlu0 %1198 }
 0x1e9   : > { %v1370_v8 = vrot.slane %v1139_v56, %v2561_v41  ;;  %v1468_v57 = vrot.slane %v1199_v0, %v2518_v33 }
 0x1eb   : > { %v1371_v17 = vsel %vm1325_vm4, %v1370_v8, %v1366_v51 }
 0x1ec   : > { %v1181_v27 = vpop.permute.xlu1 %1180  ;;  %v1118_v54 = vpop.permute.xlu0 %1117 }
 0x1ed   : > { %v1438_v39 = vrot.slane %v1181_v27, %v2534_v32  ;;  %v1331_v40 = vrot.slane %v1118_v54, %v2573_v18 }
 0x1ef   : > { %v1439_v61 = vsel %vm1311_vm2, %v1438_v39, %v1434_v23  ;;  %v1333_v60 = vsel %vm1332_vm5, %v1331_v40, %v1326_v14 }
 0x1f0   : > { %v1202_v5 = vpop.permute.xlu1 %1201  ;;  %v1163_v22 = vpop.permute.xlu0 %1162 }
 0x1f1   : > { %v1472_v47 = vrot.slane %v1202_v5, %v2514_v37  ;;  %v1409_v31 = vrot.slane %v1163_v22, %v2561_v41 }
 0x1f3   : > { %v1473_v29 = vsel %vm1304_vm1, %v1472_v47, %v1468_v57  ;;  %v1410_v43 = vsel %vm1325_vm4, %v1409_v31, %v1405_v3 }
 0x1f4   : > { %v1142_v35 = vpop.permute.xlu1 %1141  ;;  %v1205_v24 = vpop.permute.xlu0 %1204 }
 0x1f5   : > { %v1375_v16 = vrot.slane %v1142_v35, %v2573_v18  ;;  %v1477_v13 = vrot.slane %v1205_v24, %v2534_v32 }
 0x1f7   : > { %v1376_v55 = vsel %vm1332_vm5, %v1375_v16, %v1371_v17  ;;  %v2590_v21 = vsel %vm1311_vm2, %v1477_v13, %v1473_v29 }
 0x1f8   : > { %v1184_v36 = vpop.permute.xlu1 %1183  ;;  %v1226_v63 = vpop.permute.xlu0 %1225 }
 0x1f9   : > { %v1443_v42 = vrot.slane %v1184_v36, %v2548_v62  ;;  %v1511_v38 = vrot.slane %v1226_v63, %v2514_v37 }
 0x1fb   : > { %v1444_v7 = vsel %vm1318_vm3, %v1443_v42, %v1439_v61 }
 0x1fc   : > { %v1223_v15 = vpop.permute.xlu1 %1222  ;;  %v1145_v12 = vpop.permute.xlu0 %1144 }
 0x1fd   : > { %v1507_v2 = vrot.slane %v1223_v15, %v2518_v33  ;;  %v1380_v53 = vrot.slane %v1145_v12, %v2594_v10 }
 0x1ff   : > { %v2601_v28 = vsel %vm1304_vm1, %v1511_v38, %v1507_v2  ;;  %v1381_v25 = vsel %vm1339_vm6, %v1380_v53, %v1376_v55 }
 0x200   : > { %v1121_v45 = vpop.permute.xlu1 %1120  ;;  %v1187_v30 = vpop.permute.xlu0 %1186 }
 0x201   : > { %v1338_v34 = vrot.slane %v1121_v45, %v2594_v10  ;;  %v1448_v57 = vrot.slane %v1187_v30, %v2561_v41 }
 0x203   : > { %v1340_v20 = vsel %vm1339_vm6, %v1338_v34, %v1333_v60 }
 0x204   : > { %v1166_v19 = vpop.permute.xlu1 %1165  ;;  %v2606_v11 = vpop.permute.xlu0 %1228 }
 0x205   : > { %v1414_v0 = vrot.slane %v1166_v19, %v2573_v18 }
 0x207   : > { %v1415_v54 = vsel %vm1332_vm5, %v1414_v0, %v1410_v43  ;;  %v1449_v43 = vsel %vm1325_vm4, %v1448_v57, %v1444_v7 }
 0x208   : > { %v1208_v51 = vpop.permute.xlu1 %1207  ;;  %v2609_v6 = vpop.permute.xlu0 %1249 }
 0x209   : > { %v1482_v2 = vrot.slane %v1208_v51, %v2548_v62 }
 0x20b   : > { %v1483_v34 = vsel %vm1318_vm3, %v1482_v2, %v2590_v21 }
 0x20c   : > { %v2614_v50 = vpop.permute.xlu1 %1246  ;;  %v1148_v14 = vpop.permute.xlu0 %1147 }
 0x20d   : > { %v1385_v1 = vrot.slane %v1148_v14, %v2612_v26 }
 0x20f   : > { %v1386_v52 = vsel %vm1346_vm7, %v1385_v1, %v1381_v25  ;;  %v1516_v1 = vrot.slane %v2606_v11, %v2534_v32 }
 0x210   : > { %v1124_v9 = vpop.permute.xlu1 %1123  ;;  %v1190_v59 = vpop.permute.xlu0 %1189 }
 0x211   : > { %v1345_v48 = vrot.slane %v1124_v9, %v2612_v26  ;;  %v1453_v29 = vrot.slane %v1190_v59, %v2573_v18  ;;  %v1517_v0 = vsel %vm1311_vm2, %v1516_v1, %v2601_v28 }
 0x213   : > { %v1347_v46 = vsel %vm1346_vm7, %v1345_v48, %v1340_v20  ;;  %v1454_v13 = vsel %vm1332_vm5, %v1453_v29, %v1449_v43 }
 0x214   : > { %v1622_v44 = vsel %vm1621_vm8, %v1386_v52, %v1347_v46  ;;  %v1169_v23 = vpop.permute.xlu1 %1168  ;;  %v1232_v3 = vpop.permute.xlu0 %1231 }
 0x215   : > { %v1419_v8 = vrot.slane %v1169_v23, %v2594_v10  ;;  %v1521_v59 = vrot.slane %v1232_v3, %v2548_v62  ;;  %v1546_v23 = vrot.slane %v2614_v50, %v2518_v33 }
 0x217   : > { %v1420_v40 = vsel %vm1339_vm6, %v1419_v8, %v1415_v54  ;;  %v1550_v8 = vrot.slane %v2609_v6, %v2514_v37 }
 0x218   : > { %v1211_v4 = vpop.permute.xlu1 %1210  ;;  %v2620_v56 = vpop.permute.xlu0 %1270 }
 0x219   : > { %v1487_v7 = vrot.slane %v1211_v4, %v2561_v41  ;;  %v1551_v28 = vsel %vm1304_vm1, %v1550_v8, %v1546_v23 }
 0x21b   : > { %v1488_v20 = vsel %vm1325_vm4, %v1487_v7, %v1483_v34 }
 0x21c   : > { %v2624_v17 = vpop.permute.xlu1 %1252  ;;  %v1172_v27 = vpop.permute.xlu0 %1171 }
 0x21d   : > { %v1424_v39 = vrot.slane %v1172_v27, %v2612_v26  ;;  %v1555_v11 = vrot.slane %v2624_v17, %v2534_v32  ;;  %v1522_v27 = vsel %vm1318_vm3, %v1521_v59, %v1517_v0 }
 0x21f   : > { %v1425_v61 = vsel %vm1346_vm7, %v1424_v39, %v1420_v40  ;;  %v1556_v6 = vsel %vm1311_vm2, %v1555_v11, %v1551_v28 }
 0x220   : > { %v1624_v60 = vsel %vm1623_vm9, %v1425_v61, %v1622_v44  ;;  %v2630_v5 = vpop.permute.xlu1 %1273  ;;  %v1214_v22 = vpop.permute.xlu0 %1213 }
 0x221   : > { %v1492_v45 = vrot.slane %v1214_v22, %v2573_v18  ;;  %v1589_v57 = vrot.slane %v2630_v5, %v2514_v37 }
 0x223   : > { %v1493_v14 = vsel %vm1332_vm5, %v1492_v45, %v1488_v20 }
 0x224   : > { %v1193_v47 = vpop.permute.xlu1 %1192  ;;  %v1256_v31 = vpop.permute.xlu0 %1255 }
 0x225   : > { %v1458_v35 = vrot.slane %v1193_v47, %v2594_v10  ;;  %v1560_v54 = vrot.slane %v1256_v31, %v2548_v62  ;;  %v1585_v31 = vrot.slane %v2620_v56, %v2518_v33 }
 0x227   : > { %v1459_v55 = vsel %vm1339_vm6, %v1458_v35, %v1454_v13  ;;  %v1561_v29 = vsel %vm1318_vm3, %v1560_v54, %v1556_v6  ;;  %v1590_v56 = vsel %vm1304_vm1, %v1589_v57, %v1585_v31 }
 0x228   : > { %v1235_v24 = vpop.permute.xlu1 %1234  ;;  %v1196_v16 = vpop.permute.xlu0 %1195 }
 0x229   : > { %v1463_v49 = vrot.slane %v1196_v16, %v2612_v26  ;;  %v1526_v21 = vrot.slane %v1235_v24, %v2561_v41 }
 0x22b   : > { %v1464_v36 = vsel %vm1346_vm7, %v1463_v49, %v1459_v55  ;;  %v1527_v39 = vsel %vm1325_vm4, %v1526_v21, %v1522_v27 }
 0x22c   : > { %v1626_v63 = vsel %vm1625_vm10, %v1464_v36, %v1624_v60  ;;  %v1277_v42 = vpop.permute.xlu1 %1276  ;;  %v1238_v15 = vpop.permute.xlu0 %1237 }
 0x22d   : > { %v1531_v4 = vrot.slane %v1238_v15, %v2573_v18  ;;  %v1594_v35 = vrot.slane %v1277_v42, %v2534_v32 }
 0x22f   : > { %v1532_v61 = vsel %vm1332_vm5, %v1531_v4, %v1527_v39  ;;  %v1595_v36 = vsel %vm1311_vm2, %v1594_v35, %v1590_v56 }
 0x230   : > { %v1217_v12 = vpop.permute.xlu1 %1216  ;;  %v1280_v38 = vpop.permute.xlu0 %1279 }
 0x231   : > { %v1497_v30 = vrot.slane %v1217_v12, %v2594_v10  ;;  %v1599_v24 = vrot.slane %v1280_v38, %v2548_v62 }
 0x233   : > { %v1498_v9 = vsel %vm1339_vm6, %v1497_v30, %v1493_v14 }
 0x234   : > { %v1259_v53 = vpop.permute.xlu1 %1258  ;;  %v1241_v25 = vpop.permute.xlu0 %1240 }
 0x235   : > { %v1536_v3 = vrot.slane %v1241_v25, %v2594_v10  ;;  %v1565_v50 = vrot.slane %v1259_v53, %v2561_v41 }
 0x237   : > { %v1537_v47 = vsel %vm1339_vm6, %v1536_v3, %v1532_v61  ;;  %v1566_v16 = vsel %vm1325_vm4, %v1565_v50, %v1561_v29 }
 0x238   : > { %v1220_v19 = vpop.permute.xlu1 %1219  ;;  %v1283_v58 = vpop.permute.xlu0 %1282 }
 0x239   : > { %v1502_v51 = vrot.slane %v1220_v19, %v2612_v26  ;;  %v1604_v5 = vrot.slane %v1283_v58, %v2561_v41 }
 0x23b   : > { %v1503_v48 = vsel %vm1346_vm7, %v1502_v51, %v1498_v9 }
 0x23c   : > { %v1628_v52 = vsel %vm1627_vm11, %v1503_v48, %v1626_v63  ;;  %v1262_v46 = vpop.permute.xlu1 %1261  ;;  %v1265_v44 = vpop.permute.xlu0 %1264  ;;  %v1600_v63 = vsel %vm1318_vm3, %v1599_v24, %v1595_v36 }
 0x23d   : > { %v1570_v17 = vrot.slane %v1262_v46, %v2573_v18  ;;  %v1575_v13 = vrot.slane %v1265_v44, %v2594_v10  ;;  %v1605_v12 = vsel %vm1325_vm4, %v1604_v5, %v1600_v63 }
 0x23f   : > { %v1571_v55 = vsel %vm1332_vm5, %v1570_v17, %v1566_v16 }
 0x240   : > { %v1244_v40 = vpop.permute.xlu1 %1243  ;;  %v1268_v22 = vpop.permute.xlu0 %1267  ;;  %v1576_v42 = vsel %vm1339_vm6, %v1575_v13, %v1571_v55 }
 0x241   : > { %v1541_v60 = vrot.slane %v1244_v40, %v2612_v26  ;;  %v1580_v33 = vrot.slane %v1268_v22, %v2612_v26 }
 0x243   : > { %v1542_v43 = vsel %vm1346_vm7, %v1541_v60, %v1537_v47  ;;  %v1581_v41 = vsel %vm1346_vm7, %v1580_v33, %v1576_v42 }
 0x244   : > { %v1286_v49 = vpop.permute.xlu1 %1285  ;;  %v1630_v37 = vsel %vm1629_vm12, %v1542_v43, %v1628_v52  ;;  %v1292_v62 = vpop.permute.xlu0 %1291 }
 0x245   : > { %v1609_v32 = vrot.slane %v1286_v49, %v2573_v18  ;;  %v1619_v18 = vrot.slane %v1292_v62, %v2612_v26  ;;  %v1632_v25 = vsel %vm1631_vm13, %v1581_v41, %v1630_v37 }
 0x247   : > { %v1610_v2 = vsel %vm1332_vm5, %v1609_v32, %v1605_v12 }
 0x248   : > { %v1289_v15 = vpop.permute.xlu1 %1288 }
 0x249   : > { %v1614_v38 = vrot.slane %v1289_v15, %v2594_v10  ;;  %v1640_v10 = vld [vmem:[%s223_s20] sm:$0xff] }
 0x24b   : > { %v1615_v7 = vsel %vm1339_vm6, %v1614_v38, %v1610_v2 }
 0x24c   : > { %v1620_v53 = vsel %vm1346_vm7, %v1619_v18, %v1615_v7 }
 0x24d   : > { %v1634_v45 = vsel %vm1633_vm14, %v1620_v53, %v1632_v25 }
 0x24e   : > { %v1637_v30 = vsel %vm1636_vm15, %v1634_v45, 0.0 }
 0x24f   : > { %1638 = vadd.xlane.f32.xlu1 %v1637_v30 }
 0x2dc   : > { %v1639_v34 = vpop.xlane.xlu1 %1638 }
 0x2dd   : > { %v1641_v26 = vmul.f32 %v1640_v10, %v1639_v34 }
 0x2df   : > { %v1643_v20 = vsel %vm1642_vm0, %v1641_v26, 0.0 }
 0x2e0   : > { %1644 = vadd.xlane.f32.xlu0 %v1643_v20 }
 0x36d   : > { %v1645_v19 = vpop.xlane.xlu0 %1644 }
 0x36e   : > { %v1646_v58 = vrot.slane %v1645_v19, 4 }
 0x370   : > { %v1647_v14 = vadd.f32 %v1646_v58, %v1645_v19 }
 0x372   : > { %v1648_v51 = vrot.slane %v1647_v14, 2 }
 0x374   : > { %v1649_v1 = vadd.f32 %v1648_v51, %v1647_v14 }
 0x376   : > { %v1650_v9 = vrot.slane %v1649_v1, 1 }
 0x378   : > { %v1651_v59 = vadd.f32 %v1650_v9, %v1649_v1 }
 0x37a   : > { %1768 = vpush %v1651_v59 }
 0x3ab   : > { %s1769_s30 = spop %1768 }
 0x3ac   : > { %v1653_v48 = vstv %s1769_s30 }
 0x3ad   : > { %1654 = vst [vmem:[%s219_s27] sm:$0xff] %v1653_v48 }
 0x3ae   : > { %1825 = shalt.err (!%p1822_p4)
}
 0x3af   : > { %s1826_s12 = scalar_lea.hbm %s2713_s7, 128  ;;  %s1830_s20 = scalar_lea.hbm %s2757_s4, 256 }
 0x3b0   : > { %p1827_p7 = scmp.ne.s32.totalorder %s2713_s7, %s1826_s12  ;;  %p1831_p10 = scmp.lt.u32.totalorder %s2713_s7, %s2757_s4 }
 0x3b1   : > { %p1832_p11 = scmp.lt.u32.totalorder %s1830_s20, %s1826_s12  ;;  %p1834_p13 = scmp.lt.u32.totalorder %s1826_s12, %s2713_s7 }
 0x3b2   : > { %p1828_p8 = pnand %p1827_p7, %p1941_p5 }
 0x3b3   : > { %p1833_p12 = por %p1832_p11, %p1831_p10 }
 0x3b4   : > { %p1829_p9 = pneg %p1828_p8 }
 0x3b5   : > { %p1835_p0 = por %p1834_p13, %p1833_p12 }
 0x3b7   : > { %p1836_p1 = pnand %p1835_p0, %p1829_p9 }
 0x3b9   : > { %1839 = shalt.err (!%p1836_p1)
}
 0x3ba   : > { %1770 = dma.vmem_to_hbm [thread:$0]  (%p1941_p5), %s2708_s28, 128, %s2713_s7, %s1656_s8  }
 0x3bb PF: > { %p1776_p2 = scmp.ge.s32.totalorder %s1874_s18, 2  ;;  %s1681_s27 = sand.u32 1, %s1862_s15  }
 0x3bc   : > { %s1682_s29 = scalar_lea.sflag [#allocation3], %s1681_s27 }
 0x3bd   : > { %p1773_p3 = pnand %p1776_p2, %p1945_p6 }
 0x3bf   : > { %1857 = dma.done.wait (!%p1773_p3), %s1682_s29, 128  }
 0x3c0   : > { %1859 = vsyncadd (!%p1773_p3), %s1682_s29, 4294967168  ;;  %p14_p4 = scmp.ge.s32.totalorder %s1928_s21, 4   ;;  %s2800_s15 = smov %s1866_s16 }
 0x3c1   : > { %s2801_s16 = smov %s1870_s17  ;;  %s2802_s17 = smov %s1939_s24 }
 0x3c2   : > { %s2803_s18 = smov %s1928_s21  ;;  %16 = sbr.rel (!%p14_p4) target bundleno = 3 (0x3), region = 77 }
 0x3c9   :  { %1687 = vsyncpa [#allocation3], 1 }
 0x3ca   :  { %1689 = vsyncpa [#allocation3 + $0x1], 1 }

</bundles_post_ra>
